<compile_context>
chip_gen: v7x
topology: tpu7x:2x2x1
jax: 0.10.0
libtpu: 0.0.40
codegen_flags: <defaults>
</compile_context>

<pallas_src>
import jax
import jax.numpy as jnp
from jax.experimental import pallas as pl
from jax.experimental.pallas import tpu as pltpu


def _spectral_mul_kernel(a_ref, w_ref, o_ref):
    # a_ref: (2, Cin, tf)        re/im of one (corner, batch) slab of modes
    # w_ref: (2, Cin, Cout, tf)  matching corner weights (re/im)
    # o_ref: (2, Cout, tf)
    _, cin, tf = a_ref.shape
    cout = w_ref.shape[2]

    acc_re = jnp.zeros((cout, tf), jnp.float32)
    acc_im = jnp.zeros((cout, tf), jnp.float32)

    # Unrolled Cin reduction: one (1, tf) activation row per input channel is
    # broadcast over the Cout sublanes of the matching weight slab. Keeps the
    # live set at two (Cout, tf) accumulators regardless of Cin.
    for i in range(cin):
        a_re = a_ref[0, pl.ds(i, 1), :]          # (1, tf)
        a_im = a_ref[1, pl.ds(i, 1), :]
        w_re = w_ref[0, i, :, :]                 # (Cout, tf)
        w_im = w_ref[1, i, :, :]
        acc_re = acc_re + a_re * w_re - a_im * w_im
        acc_im = acc_im + a_re * w_im + a_im * w_re

    o_ref[0, :, :] = acc_re.astype(o_ref.dtype)
    o_ref[1, :, :] = acc_im.astype(o_ref.dtype)


def _pick_mode_tile(f_pad, cin, cout, max_tf=8192, vmem_budget=24 * 1024 * 1024):
    """Largest 128-multiple tile of the (padded) mode axis that divides f_pad
    and keeps the double-buffered per-step footprint under `vmem_budget`."""
    # bytes per lane of tf, double-buffered: 2 * 4B * (a + w + o) sublane rows
    bytes_per_lane = 2 * 4 * (2 * cin + 2 * cin * cout + 2 * cout)
    cap = max(128, min(max_tf, (vmem_budget // bytes_per_lane) // 128 * 128))
    tf = min(f_pad, cap)
    tf = max(128, (tf // 128) * 128)
    while tf > 128 and f_pad % tf:
        tf -= 128
    return tf


def _spectral_mul(a_ri, w_ri):
    """a_ri: (4, B, 2, Cin, F) f32; w_ri: (4, 2, Cin, Cout, F) f32
       returns (4, B, 2, Cout, F) f32."""
    n_corner, batch, _, cin, f_total = a_ri.shape
    cout = w_ri.shape[3]

    # Lane-align the flattened mode axis (guarantees unmasked vst / bounded tiles).
    f_pad = ((f_total + 127) // 128) * 128
    if f_pad != f_total:
        pad = f_pad - f_total
        a_ri = jnp.pad(a_ri, ((0, 0), (0, 0), (0, 0), (0, 0), (0, pad)))
        w_ri = jnp.pad(w_ri, ((0, 0), (0, 0), (0, 0), (0, 0), (0, pad)))

    tf = _pick_mode_tile(f_pad, cin, cout)
    # batch innermost -> weight block index unchanged across consecutive steps
    # -> Pallas skips the weight re-fetch (dominant HBM traffic).
    grid = (n_corner, f_pad // tf, batch)

    a_spec = pl.BlockSpec((None, None, 2, cin, tf), lambda c, f, b: (c, b, 0, 0, f))
    w_spec = pl.BlockSpec((None, 2, cin, cout, tf), lambda c, f, b: (c, 0, 0, 0, f))
    o_spec = pl.BlockSpec((None, None, 2, cout, tf), lambda c, f, b: (c, b, 0, 0, f))

    # 4 mul + 4 add per complex MAC, contracted over Cin.
    flops = 8 * n_corner * batch * cin * cout * f_pad
    bytes_accessed = 4 * (
        2 * n_corner * batch * cin * f_pad       # activations (re+im)
        + 2 * n_corner * cin * cout * f_pad      # weights (re+im), reused over batch
        + 2 * n_corner * batch * cout * f_pad)   # outputs (re+im)

    out = pl.pallas_call(
        _spectral_mul_kernel,
        out_shape=jax.ShapeDtypeStruct((n_corner, batch, 2, cout, f_pad), jnp.float32),
        grid_spec=pltpu.PrefetchScalarGridSpec(
            num_scalar_prefetch=0,
            grid=grid,
            in_specs=[a_spec, w_spec],
            out_specs=o_spec,
        ),
        compiler_params=pltpu.CompilerParams(
            # corner (extent 4) leads for megacore splitting; batch arbitrary to
            # preserve the batch-innermost weight reuse.
            dimension_semantics=("parallel", "parallel", "arbitrary"),
            vmem_limit_bytes=32 * 1024 * 1024,   # tiles are capped to fit; safe on v5e/v6e/v7x
        ),
        cost_estimate=pl.CostEstimate(
            flops=flops, transcendentals=0, bytes_accessed=bytes_accessed),
    )(a_ri, w_ri)

    if f_pad != f_total:
        out = out[..., :f_total]
    return out


def pack_spectral_weights(weights):
    """(4, Cin, Cout, m1, m2, m3) complex64 -> (4, 2, Cin, Cout, m1, m2, m3) f32.
    Done once, outside the jitted forward."""
    return jnp.stack([jnp.real(weights), jnp.imag(weights)], axis=1).astype(jnp.float32)


@jax.jit
def spectral_conv3d(x, w_packed):
    """SpectralConv3d forward.

    x:        (B, Cin, D1, D2, D3) float32
    w_packed: (4, 2, Cin, Cout, m1, m2, m3) float32  (weights1..4 stacked, re/im split)
    returns   (B, Cout, D1, D2, D3) float32
    """
    batch, cin, d1, d2, d3 = x.shape
    n_corner, _, _, cout, m1, m2, m3 = w_packed.shape
    d3r = d3 // 2 + 1
    f_total = m1 * m2 * m3

    x_ft = jnp.fft.rfftn(x, axes=(-3, -2, -1))              # (B, Cin, D1, D2, D3r) c64

    corners = jnp.stack(
        [x_ft[:, :, :m1, :m2, :m3],
         x_ft[:, :, -m1:, :m2, :m3],
         x_ft[:, :, :m1, -m2:, :m3],
         x_ft[:, :, -m1:, -m2:, :m3]], axis=0)               # (4, B, Cin, m1, m2, m3)
    a_c = corners.reshape(n_corner, batch, cin, f_total)
    a_ri = jnp.stack([jnp.real(a_c), jnp.imag(a_c)], axis=2).astype(jnp.float32)
    w_ri = w_packed.reshape(n_corner, 2, cin, cout, f_total)

    o_ri = _spectral_mul(a_ri, w_ri)                         # (4, B, 2, Cout, F)

    out_c = jax.lax.complex(o_ri[:, :, 0], o_ri[:, :, 1]).reshape(
        n_corner, batch, cout, m1, m2, m3)

    out_ft = jnp.zeros((batch, cout, d1, d2, d3r), jnp.complex64)
    out_ft = out_ft.at[:, :, :m1, :m2, :m3].set(out_c[0])
    out_ft = out_ft.at[:, :, -m1:, :m2, :m3].set(out_c[1])
    out_ft = out_ft.at[:, :, :m1, -m2:, :m3].set(out_c[2])
    out_ft = out_ft.at[:, :, -m1:, -m2:, :m3].set(out_c[3])

    return jnp.fft.irfftn(out_ft, s=(d1, d2, d3), axes=(-3, -2, -1))


def init_spectral_weights(key, in_channels, out_channels, m1, m2, m3):
    """scale * torch.rand(..., dtype=cfloat): uniform[0,1) real & imag parts."""
    scale = 1.0 / (in_channels * out_channels)
    kr, ki = jax.random.split(key)
    shape = (4, in_channels, out_channels, m1, m2, m3)
    w_re = scale * jax.random.uniform(kr, shape, jnp.float32)
    w_im = scale * jax.random.uniform(ki, shape, jnp.float32)
    return (w_re + 1j * w_im).astype(jnp.complex64)


def spectral_conv3d_reference(x, weights):
    """Pure-JAX reference matching the PyTorch forward exactly."""
    batch, cin, d1, d2, d3 = x.shape
    _, _, cout, m1, m2, m3 = weights.shape
    x_ft = jnp.fft.rfftn(x, axes=(-3, -2, -1))
    cm = lambda a, b: jnp.einsum('bixyz,ioxyz->boxyz', a, b)
    out_ft = jnp.zeros((batch, cout, d1, d2, d3 // 2 + 1), jnp.complex64)
    out_ft = out_ft.at[:, :, :m1, :m2, :m3].set(cm(x_ft[:, :, :m1, :m2, :m3], weights[0]))
    out_ft = out_ft.at[:, :, -m1:, :m2, :m3].set(cm(x_ft[:, :, -m1:, :m2, :m3], weights[1]))
    out_ft = out_ft.at[:, :, :m1, -m2:, :m3].set(cm(x_ft[:, :, :m1, -m2:, :m3], weights[2]))
    out_ft = out_ft.at[:, :, -m1:, -m2:, :m3].set(cm(x_ft[:, :, -m1:, -m2:, :m3], weights[3]))
    return jnp.fft.irfftn(out_ft, s=(d1, d2, d3), axes=(-3, -2, -1))


if __name__ == "__main__":
    B, Cin, Cout = 2, 4, 8
    D1 = D2 = D3 = 16
    m1 = m2 = m3 = 8          # F = 512 retained modes per corner (lane-dense)

    key = jax.random.PRNGKey(0)
    kx, kw = jax.random.split(key)
    x = jax.random.normal(kx, (B, Cin, D1, D2, D3), jnp.float32)
    weights = init_spectral_weights(kw, Cin, Cout, m1, m2, m3)
    w_packed = pack_spectral_weights(weights)    # once, outside the jitted forward

    out = jax.block_until_ready(spectral_conv3d(x, w_packed))
    ref = jax.block_until_ready(spectral_conv3d_reference(x, weights))

    assert out.shape == (B, Cout, D1, D2, D3), out.shape
    max_err = float(jnp.max(jnp.abs(out - ref)))
    assert jnp.allclose(out, ref, atol=1e-4, rtol=1e-4), max_err

    print("KERNEL_OK")
</pallas_src>

<mosaic_0001>
module attributes {stable_mosaic.version = 11 : i64} {
  func.func @_spectral_mul_kernel(%arg0: i32, %arg1: i32, %arg2: i32, %arg3: memref<1x1x2x4x512xf32, #tpu.memory_space<vmem>>, %arg4: memref<1x2x4x8x512xf32, #tpu.memory_space<vmem>>, %arg5: memref<1x1x2x8x512xf32, #tpu.memory_space<vmem>>) attributes {dimension_semantics = [#tpu.dimension_semantics<parallel>, #tpu.dimension_semantics<parallel>, #tpu.dimension_semantics<arbitrary>], iteration_bounds = array<i64: 4, 1, 2>, scalar_prefetch = 0 : i64, scratch_operands = 0 : i64, tpu.core_type = #tpu.core_type<tc>, window_params = [{transform_indices = @transform_0, window_bounds = array<i64: 1, 1, 2, 4, 512>}, {transform_indices = @transform_1, window_bounds = array<i64: 1, 2, 4, 8, 512>}, {transform_indices = @transform_2, window_bounds = array<i64: 1, 1, 2, 8, 512>}]} {
    %cst = arith.constant 0.000000e+00 : f32
    %0 = vector.broadcast %cst : f32 to vector<8x512xf32>
    %cst_0 = arith.constant 0.000000e+00 : f32
    %1 = vector.broadcast %cst_0 : f32 to vector<8x512xf32>
    %c0 = arith.constant 0 : index
    %c0_1 = arith.constant 0 : index
    %c0_2 = arith.constant 0 : index
    %c0_3 = arith.constant 0 : index
    %c0_4 = arith.constant 0 : index
    %2 = vector.load %arg3[%c0, %c0_1, %c0_2, %c0_3, %c0_4] : memref<1x1x2x4x512xf32, #tpu.memory_space<vmem>>, vector<1x1x1x1x512xf32>
    %3 = vector.shape_cast %2 : vector<1x1x1x1x512xf32> to vector<1x512xf32>
    %c0_5 = arith.constant 0 : index
    %c0_6 = arith.constant 0 : index
    %c1 = arith.constant 1 : index
    %c0_7 = arith.constant 0 : index
    %c0_8 = arith.constant 0 : index
    %4 = vector.load %arg3[%c0_5, %c0_6, %c1, %c0_7, %c0_8] : memref<1x1x2x4x512xf32, #tpu.memory_space<vmem>>, vector<1x1x1x1x512xf32>
    %5 = vector.shape_cast %4 : vector<1x1x1x1x512xf32> to vector<1x512xf32>
    %c0_9 = arith.constant 0 : index
    %c0_10 = arith.constant 0 : index
    %c0_11 = arith.constant 0 : index
    %c0_12 = arith.constant 0 : index
    %c0_13 = arith.constant 0 : index
    %6 = vector.load %arg4[%c0_9, %c0_10, %c0_11, %c0_12, %c0_13] : memref<1x2x4x8x512xf32, #tpu.memory_space<vmem>>, vector<1x1x1x8x512xf32>
    %7 = vector.shape_cast %6 : vector<1x1x1x8x512xf32> to vector<8x512xf32>
    %c0_14 = arith.constant 0 : index
    %c1_15 = arith.constant 1 : index
    %c0_16 = arith.constant 0 : index
    %c0_17 = arith.constant 0 : index
    %c0_18 = arith.constant 0 : index
    %8 = vector.load %arg4[%c0_14, %c1_15, %c0_16, %c0_17, %c0_18] : memref<1x2x4x8x512xf32, #tpu.memory_space<vmem>>, vector<1x1x1x8x512xf32>
    %9 = vector.shape_cast %8 : vector<1x1x1x8x512xf32> to vector<8x512xf32>
    %10 = vector.broadcast %3 : vector<1x512xf32> to vector<8x512xf32>
    %11 = arith.mulf %10, %7 : vector<8x512xf32>
    %12 = arith.addf %0, %11 : vector<8x512xf32>
    %13 = vector.broadcast %5 : vector<1x512xf32> to vector<8x512xf32>
    %14 = arith.mulf %13, %9 : vector<8x512xf32>
    %15 = arith.subf %12, %14 : vector<8x512xf32>
    %16 = vector.broadcast %3 : vector<1x512xf32> to vector<8x512xf32>
    %17 = arith.mulf %16, %9 : vector<8x512xf32>
    %18 = arith.addf %1, %17 : vector<8x512xf32>
    %19 = vector.broadcast %5 : vector<1x512xf32> to vector<8x512xf32>
    %20 = arith.mulf %19, %7 : vector<8x512xf32>
    %21 = arith.addf %18, %20 : vector<8x512xf32>
    %c0_19 = arith.constant 0 : index
    %c0_20 = arith.constant 0 : index
    %c0_21 = arith.constant 0 : index
    %c1_22 = arith.constant 1 : index
    %c0_23 = arith.constant 0 : index
    %22 = vector.load %arg3[%c0_19, %c0_20, %c0_21, %c1_22, %c0_23] : memref<1x1x2x4x512xf32, #tpu.memory_space<vmem>>, vector<1x1x1x1x512xf32>
    %23 = vector.shape_cast %22 : vector<1x1x1x1x512xf32> to vector<1x512xf32>
    %c0_24 = arith.constant 0 : index
    %c0_25 = arith.constant 0 : index
    %c1_26 = arith.constant 1 : index
    %c1_27 = arith.constant 1 : index
    %c0_28 = arith.constant 0 : index
    %24 = vector.load %arg3[%c0_24, %c0_25, %c1_26, %c1_27, %c0_28] : memref<1x1x2x4x512xf32, #tpu.memory_space<vmem>>, vector<1x1x1x1x512xf32>
    %25 = vector.shape_cast %24 : vector<1x1x1x1x512xf32> to vector<1x512xf32>
    %c0_29 = arith.constant 0 : index
    %c0_30 = arith.constant 0 : index
    %c1_31 = arith.constant 1 : index
    %c0_32 = arith.constant 0 : index
    %c0_33 = arith.constant 0 : index
    %26 = vector.load %arg4[%c0_29, %c0_30, %c1_31, %c0_32, %c0_33] : memref<1x2x4x8x512xf32, #tpu.memory_space<vmem>>, vector<1x1x1x8x512xf32>
    %27 = vector.shape_cast %26 : vector<1x1x1x8x512xf32> to vector<8x512xf32>
    %c0_34 = arith.constant 0 : index
    %c1_35 = arith.constant 1 : index
    %c1_36 = arith.constant 1 : index
    %c0_37 = arith.constant 0 : index
    %c0_38 = arith.constant 0 : index
    %28 = vector.load %arg4[%c0_34, %c1_35, %c1_36, %c0_37, %c0_38] : memref<1x2x4x8x512xf32, #tpu.memory_space<vmem>>, vector<1x1x1x8x512xf32>
    %29 = vector.shape_cast %28 : vector<1x1x1x8x512xf32> to vector<8x512xf32>
    %30 = vector.broadcast %23 : vector<1x512xf32> to vector<8x512xf32>
    %31 = arith.mulf %30, %27 : vector<8x512xf32>
    %32 = arith.addf %15, %31 : vector<8x512xf32>
    %33 = vector.broadcast %25 : vector<1x512xf32> to vector<8x512xf32>
    %34 = arith.mulf %33, %29 : vector<8x512xf32>
    %35 = arith.subf %32, %34 : vector<8x512xf32>
    %36 = vector.broadcast %23 : vector<1x512xf32> to vector<8x512xf32>
    %37 = arith.mulf %36, %29 : vector<8x512xf32>
    %38 = arith.addf %21, %37 : vector<8x512xf32>
    %39 = vector.broadcast %25 : vector<1x512xf32> to vector<8x512xf32>
    %40 = arith.mulf %39, %27 : vector<8x512xf32>
    %41 = arith.addf %38, %40 : vector<8x512xf32>
    %c0_39 = arith.constant 0 : index
    %c0_40 = arith.constant 0 : index
    %c0_41 = arith.constant 0 : index
    %c2 = arith.constant 2 : index
    %c0_42 = arith.constant 0 : index
    %42 = vector.load %arg3[%c0_39, %c0_40, %c0_41, %c2, %c0_42] : memref<1x1x2x4x512xf32, #tpu.memory_space<vmem>>, vector<1x1x1x1x512xf32>
    %43 = vector.shape_cast %42 : vector<1x1x1x1x512xf32> to vector<1x512xf32>
    %c0_43 = arith.constant 0 : index
    %c0_44 = arith.constant 0 : index
    %c1_45 = arith.constant 1 : index
    %c2_46 = arith.constant 2 : index
    %c0_47 = arith.constant 0 : index
    %44 = vector.load %arg3[%c0_43, %c0_44, %c1_45, %c2_46, %c0_47] : memref<1x1x2x4x512xf32, #tpu.memory_space<vmem>>, vector<1x1x1x1x512xf32>
    %45 = vector.shape_cast %44 : vector<1x1x1x1x512xf32> to vector<1x512xf32>
    %c0_48 = arith.constant 0 : index
    %c0_49 = arith.constant 0 : index
    %c2_50 = arith.constant 2 : index
    %c0_51 = arith.constant 0 : index
    %c0_52 = arith.constant 0 : index
    %46 = vector.load %arg4[%c0_48, %c0_49, %c2_50, %c0_51, %c0_52] : memref<1x2x4x8x512xf32, #tpu.memory_space<vmem>>, vector<1x1x1x8x512xf32>
    %47 = vector.shape_cast %46 : vector<1x1x1x8x512xf32> to vector<8x512xf32>
    %c0_53 = arith.constant 0 : index
    %c1_54 = arith.constant 1 : index
    %c2_55 = arith.constant 2 : index
    %c0_56 = arith.constant 0 : index
    %c0_57 = arith.constant 0 : index
    %48 = vector.load %arg4[%c0_53, %c1_54, %c2_55, %c0_56, %c0_57] : memref<1x2x4x8x512xf32, #tpu.memory_space<vmem>>, vector<1x1x1x8x512xf32>
    %49 = vector.shape_cast %48 : vector<1x1x1x8x512xf32> to vector<8x512xf32>
    %50 = vector.broadcast %43 : vector<1x512xf32> to vector<8x512xf32>
    %51 = arith.mulf %50, %47 : vector<8x512xf32>
    %52 = arith.addf %35, %51 : vector<8x512xf32>
    %53 = vector.broadcast %45 : vector<1x512xf32> to vector<8x512xf32>
    %54 = arith.mulf %53, %49 : vector<8x512xf32>
    %55 = arith.subf %52, %54 : vector<8x512xf32>
    %56 = vector.broadcast %43 : vector<1x512xf32> to vector<8x512xf32>
    %57 = arith.mulf %56, %49 : vector<8x512xf32>
    %58 = arith.addf %41, %57 : vector<8x512xf32>
    %59 = vector.broadcast %45 : vector<1x512xf32> to vector<8x512xf32>
    %60 = arith.mulf %59, %47 : vector<8x512xf32>
    %61 = arith.addf %58, %60 : vector<8x512xf32>
    %c0_58 = arith.constant 0 : index
    %c0_59 = arith.constant 0 : index
    %c0_60 = arith.constant 0 : index
    %c3 = arith.constant 3 : index
    %c0_61 = arith.constant 0 : index
    %62 = vector.load %arg3[%c0_58, %c0_59, %c0_60, %c3, %c0_61] : memref<1x1x2x4x512xf32, #tpu.memory_space<vmem>>, vector<1x1x1x1x512xf32>
    %63 = vector.shape_cast %62 : vector<1x1x1x1x512xf32> to vector<1x512xf32>
    %c0_62 = arith.constant 0 : index
    %c0_63 = arith.constant 0 : index
    %c1_64 = arith.constant 1 : index
    %c3_65 = arith.constant 3 : index
    %c0_66 = arith.constant 0 : index
    %64 = vector.load %arg3[%c0_62, %c0_63, %c1_64, %c3_65, %c0_66] : memref<1x1x2x4x512xf32, #tpu.memory_space<vmem>>, vector<1x1x1x1x512xf32>
    %65 = vector.shape_cast %64 : vector<1x1x1x1x512xf32> to vector<1x512xf32>
    %c0_67 = arith.constant 0 : index
    %c0_68 = arith.constant 0 : index
    %c3_69 = arith.constant 3 : index
    %c0_70 = arith.constant 0 : index
    %c0_71 = arith.constant 0 : index
    %66 = vector.load %arg4[%c0_67, %c0_68, %c3_69, %c0_70, %c0_71] : memref<1x2x4x8x512xf32, #tpu.memory_space<vmem>>, vector<1x1x1x8x512xf32>
    %67 = vector.shape_cast %66 : vector<1x1x1x8x512xf32> to vector<8x512xf32>
    %c0_72 = arith.constant 0 : index
    %c1_73 = arith.constant 1 : index
    %c3_74 = arith.constant 3 : index
    %c0_75 = arith.constant 0 : index
    %c0_76 = arith.constant 0 : index
    %68 = vector.load %arg4[%c0_72, %c1_73, %c3_74, %c0_75, %c0_76] : memref<1x2x4x8x512xf32, #tpu.memory_space<vmem>>, vector<1x1x1x8x512xf32>
    %69 = vector.shape_cast %68 : vector<1x1x1x8x512xf32> to vector<8x512xf32>
    %70 = vector.broadcast %63 : vector<1x512xf32> to vector<8x512xf32>
    %71 = arith.mulf %70, %67 : vector<8x512xf32>
    %72 = arith.addf %55, %71 : vector<8x512xf32>
    %73 = vector.broadcast %65 : vector<1x512xf32> to vector<8x512xf32>
    %74 = arith.mulf %73, %69 : vector<8x512xf32>
    %75 = arith.subf %72, %74 : vector<8x512xf32>
    %76 = vector.broadcast %63 : vector<1x512xf32> to vector<8x512xf32>
    %77 = arith.mulf %76, %69 : vector<8x512xf32>
    %78 = arith.addf %61, %77 : vector<8x512xf32>
    %79 = vector.broadcast %65 : vector<1x512xf32> to vector<8x512xf32>
    %80 = arith.mulf %79, %67 : vector<8x512xf32>
    %81 = arith.addf %78, %80 : vector<8x512xf32>
    %c0_77 = arith.constant 0 : index
    %c0_78 = arith.constant 0 : index
    %c0_79 = arith.constant 0 : index
    %c0_80 = arith.constant 0 : index
    %c0_81 = arith.constant 0 : index
    %82 = vector.load %arg5[%c0_77, %c0_78, %c0_79, %c0_80, %c0_81] : memref<1x1x2x8x512xf32, #tpu.memory_space<vmem>>, vector<1x1x1x8x512xf32>
    %83 = vector.shape_cast %82 : vector<1x1x1x8x512xf32> to vector<8x512xf32>
    %84 = vector.shape_cast %75 : vector<8x512xf32> to vector<1x1x1x8x512xf32>
    tpu.vector_store %arg5[%c0_77, %c0_78, %c0_79, %c0_80, %c0_81], %84 {strides = array<i32>} : memref<1x1x2x8x512xf32, #tpu.memory_space<vmem>>, vector<1x1x1x8x512xf32>,
    %c0_82 = arith.constant 0 : index
    %c0_83 = arith.constant 0 : index
    %c1_84 = arith.constant 1 : index
    %c0_85 = arith.constant 0 : index
    %c0_86 = arith.constant 0 : index
    %85 = vector.load %arg5[%c0_82, %c0_83, %c1_84, %c0_85, %c0_86] : memref<1x1x2x8x512xf32, #tpu.memory_space<vmem>>, vector<1x1x1x8x512xf32>
    %86 = vector.shape_cast %85 : vector<1x1x1x8x512xf32> to vector<8x512xf32>
    %87 = vector.shape_cast %81 : vector<8x512xf32> to vector<1x1x1x8x512xf32>
    tpu.vector_store %arg5[%c0_82, %c0_83, %c1_84, %c0_85, %c0_86], %87 {strides = array<i32>} : memref<1x1x2x8x512xf32, #tpu.memory_space<vmem>>, vector<1x1x1x8x512xf32>,
    return
  }
  func.func @transform_0(%arg0: i32, %arg1: i32, %arg2: i32) -> (i32, i32, i32, i32, i32) {
    %c0_i32 = arith.constant 0 : i32
    %c0_i32_0 = arith.constant 0 : i32
    %c0_i32_1 = arith.constant 0 : i32
    return %arg0, %arg2, %c0_i32, %c0_i32_0, %arg1 : i32, i32, i32, i32, i32
  }
  func.func @transform_1(%arg0: i32, %arg1: i32, %arg2: i32) -> (i32, i32, i32, i32, i32) {
    %c0_i32 = arith.constant 0 : i32
    %c0_i32_0 = arith.constant 0 : i32
    %c0_i32_1 = arith.constant 0 : i32
    %c0_i32_2 = arith.constant 0 : i32
    return %arg0, %c0_i32, %c0_i32_0, %c0_i32_1, %arg1 : i32, i32, i32, i32, i32
  }
  func.func @transform_2(%arg0: i32, %arg1: i32, %arg2: i32) -> (i32, i32, i32, i32, i32) {
    %c0_i32 = arith.constant 0 : i32
    %c0_i32_0 = arith.constant 0 : i32
    %c0_i32_1 = arith.constant 0 : i32
    return %arg0, %arg2, %c0_i32, %c0_i32_0, %arg1 : i32, i32, i32, i32, i32
  }
}

</mosaic_0001>

<bundles_post_ra>
// kernel: spectral_conv3d.1
= control target key start
LH: loop header
LB: loop body
LE: loop exit
PB: predicated region body
PF: predicated region fallthrough
CT: control target
= control target key end

     0   :  { %s895_s9 = smov 0   ;;  %s897_s10 = smov 0   ;;  %s1313_s0 = inlined_call_operand.vmem [shape: f32[4,2,2,4,512], index: 0, kind: input, shape index: {}]   ;;  %s1314_s1 = inlined_call_operand.vmem [shape: f32[4,2,4,8,512], index: 1, kind: input, shape index: {}]   ;;  %s1315_s2 = inlined_call_operand.vmem [shape: f32[4,2,2,8,512], index: 2, kind: output, shape index: {}]  }
   0x1   :  { %s899_s11 = smov 0   ;;  %s901_s12 = smov 0  }
   0x2   :  { %s903_s13 = smov 0  }
   0x3 LB: > { %s24_s14 = sadd.s32 1, %s870_s11  ;;  %s31_s15 = sadd.s32 1, %s874_s12  ;;  %s878_s13 = sphi %s903_s13, %s12_s13   ;;  %s874_s12 = sphi %s901_s12, %s1364_s12   ;;  %s870_s11 = sphi %s899_s11, %s1363_s11   ;;  %s866_s10 = sphi %s897_s10, %s1362_s10   ;;  %s862_s9 = sphi %s895_s9, %s1361_s9  }
   0x4   : > { %p25_p0 = scmp.ge.s32.totalorder %s24_s14, 2  ;;  %p749_p1 = scmp.ge.s32.totalorder %s878_s13, 1 }
   0x5   : > { %p165_p2 = scmp.lt.s32.totalorder %s878_s13, 9 }
   0x6   : > { %s1366_s14 = smov (%p25_p0, %s24_s14), 0  ;;  %s1368_s15 = smov (!%p25_p0, %s31_s15), %s874_s12 }
   0x7   : > { %p166_p3 = pnand %p749_p1, %p165_p2  ;;  %p33_p4 = scmp.ge.s32.totalorder %s1368_s15, 4 }
   0x9   : > { %s1370_s15 = smov (%p33_p4, %s1368_s15), 0  ;;  %169 = sbr.rel (%p166_p3) target bundleno = 72 (0x48), region = 28 }
  0x10   : > { %p213_p5 = scmp.lt.s32.totalorder %s866_s10, 3  ;;  %p215_p6 = scmp.lt.s32.totalorder %s862_s9, 1  ;;  %v263_v0 = vlaneseq }
  0x12   : > { %s1372_s10 = smov (!%p213_p5, %s866_s10), 3  ;;  %v264_v1 = vshrl.u32 %v263_v0, 7  ;;  %s1374_s9 = smov (!%p215_p6, %s862_s9), 1 }
  0x13   : > { %s751_s16 = sshll.u32 %s1372_s10, 4  ;;  %s799_s17 = sshll.u32 %s1372_s10, 8 }
  0x14   : > { %s750_s18 = sshll.u32 %s1374_s9, 3  ;;  %s928_s21 = scalar_lea.vmem %s1314_s1, %s799_s17  ;;  %v265_v2 = vsub.s32 0, %v264_v1  ;;  %v269_v3 = vsub.s32 1, %v264_v1  ;;  %v945_v7 = vsub.s32 2, %v264_v1  ;;  %v1020_v36 = vsub.s32 3, %v264_v1 }
  0x15   : > { %s930_s22 = sadd.s32 %s751_s16, %s750_s18  ;;  %v937_v4 = vld [vmem:[%s928_s21] sm:$0xff]  ;;  %v952_v10 = vld [vmem:[%s928_s21 + $0x8] sm:$0xff]  ;;  %v1055_v52 = vld [vmem:[%s928_s21 + $0x10] sm:$0xff] }
  0x16   : > { %s752_s23 = sshll.u32 %s930_s22, 2  ;;  %v940_v5 = vld [vmem:[%s928_s21 + $0x80] sm:$0xff]  ;;  %v1012_v33 = vld [vmem:[%s928_s21 + $0x88] sm:$0xff]  ;;  %v1066_v57 = vld [vmem:[%s928_s21 + $0x90] sm:$0xff]  ;;  %s757_s27 = sshll.u32 %s930_s22, 3 }
  0x17   : > { %s224_s26 = scalar_lea.vmem %s1313_s0, %s752_s23  ;;  %v943_v6 = vld [vmem:[%s928_s21 + $0x20] sm:$0xff]  ;;  %v1015_v34 = vld [vmem:[%s928_s21 + $0x28] sm:$0xff]  ;;  %s1162_s30 = scalar_lea.vmem %s1315_s2, %s757_s27 }
  0x18   : > { %v947_v8 = vld [vmem:[%s224_s26] ss:$4 sm:$0xf]  ;;  %v949_v9 = vld [vmem:[%s224_s26 + $0x10] ss:$4 sm:$0xf] }
  0x19   : > { %v955_v11 = vrot.slane %v947_v8, %v265_v2  ;;  %v958_v12 = vrot.slane %v949_v9, %v265_v2  ;;  %v960_v13 = vld [vmem:[%s224_s26 + $0x1] ss:$4 sm:$0xf]  ;;  %v962_v14 = vld [vmem:[%s224_s26 + $0x11] ss:$4 sm:$0xf]  ;;  %v968_v16 = vrot.slane %v947_v8, %v269_v3  ;;  %v984_v22 = vrot.slane %v949_v9, %v269_v3 }
  0x1a   : > { %v965_v15 = vld [vmem:[%s928_s21 + $0x40] sm:$0xff]  ;;  %v974_v18 = vrot.slane %v960_v13, %v265_v2  ;;  %v977_v19 = vrot.slane %v962_v14, %v265_v2  ;;  %v981_v21 = vld [vmem:[%s224_s26 + $0x12] ss:$4 sm:$0xf]  ;;  %v987_v23 = vrot.slane %v960_v13, %v269_v3  ;;  %v1018_v35 = vrot.slane %v962_v14, %v269_v3  ;;  %v1043_v48 = vld [vmem:[%s928_s21 + $0xa8] sm:$0xff] }
  0x1b   : > { %v971_v17 = vld [vmem:[%s928_s21 + $0xa0] sm:$0xff]  ;;  %v283_v24 = vmul.f32 %v955_v11, %v937_v4  ;;  %v312_v25 = vmul.f32 %v940_v5, %v958_v12  ;;  %v997_v27 = vrot.slane %v981_v21, %v265_v2  ;;  %v1001_v29 = vld [vmem:[%s224_s26 + $0x13] ss:$4 sm:$0xf]  ;;  %v284_v41 = vmul.f32 %v968_v16, %v952_v10  ;;  %v1046_v49 = vld [vmem:[%s928_s21 + $0x48] sm:$0xff] }
  0x1c   : > { %v979_v20 = vld [vmem:[%s224_s26 + $0x2] ss:$4 sm:$0xf]  ;;  %v999_v28 = vld [vmem:[%s224_s26 + $0x3] ss:$4 sm:$0xf]  ;;  %v371_v30 = vmul.f32 %v943_v6, %v974_v18  ;;  %v400_v38 = vmul.f32 %v971_v17, %v977_v19  ;;  %v1028_v40 = vrot.slane %v1001_v29, %v265_v2  ;;  %v313_v44 = vmul.f32 %v1012_v33, %v984_v22 }
  0x1d   : > { %v994_v26 = vrot.slane %v979_v20, %v265_v2  ;;  %v1006_v31 = vld [vmem:[%s928_s21 + $0x60] sm:$0xff]  ;;  %v1009_v32 = vrot.slane %v999_v28, %v265_v2  ;;  %v316_v37 = vsub.f32 %v283_v24, %v312_v25  ;;  %v372_v45 = vmul.f32 %v1015_v34, %v987_v23  ;;  %1332 = vst [vmem:[#allocation3_spill] sm:$0xff] %v1046_v49  ;;  %v1075_v61 = vld [vmem:[%s928_s21 + $0xc8] sm:$0xff] }
  0x1e   : > { %1331 = vst [vmem:[#allocation2_spill] sm:$0xff] %v1006_v31  ;;  %v1025_v39 = vld [vmem:[%s928_s21 + $0xc0] sm:$0xff]  ;;  %v1049_v50 = vrot.slane %v979_v20, %v269_v3  ;;  %v1052_v51 = vrot.slane %v981_v21, %v269_v3  ;;  %v317_v54 = vsub.f32 %v284_v41, %v313_v44  ;;  %v401_v55 = vmul.f32 %v1043_v48, %v1018_v35  ;;  %v1078_v62 = vld [vmem:[%s928_s21 + $0x68] sm:$0xff]  ;;  %v1107_v44 = vld [vmem:[%s928_s21 + $0x50] sm:$0xff] }
  0x1f   : > { %v459_v42 = vmul.f32 %v965_v15, %v994_v26  ;;  %v488_v43 = vmul.f32 %v1025_v39, %v997_v27  ;;  %v375_v46 = vadd.f32 %v371_v30, %v316_v37  ;;  %v547_v47 = vmul.f32 %v1006_v31, %v1009_v32  ;;  %v1058_v53 = vld [vmem:[%s928_s21 + $0xe0] sm:$0xff]  ;;  %1336 = vst [vmem:[#allocation7_spill] sm:$0xff] %v1075_v61  ;;  %v1094_v30 = vld [vmem:[%s928_s21 + $0x30] sm:$0xff] }
  0x20   : > { %1333 = vst [vmem:[#allocation4_spill] sm:$0xff] %v1049_v50  ;;  %1334 = vst [vmem:[#allocation5_spill] sm:$0xff] %v1052_v51  ;;  %v1063_v56 = vrot.slane %v999_v28, %v269_v3  ;;  %v1070_v58 = vrot.slane %v947_v8, %v945_v7  ;;  %v576_v60 = vmul.f32 %v1058_v53, %v1028_v40 }
  0x21   : > { %v404_v59 = vsub.f32 %v375_v46, %v400_v38  ;;  %1337 = vst [vmem:[#allocation8_spill] sm:$0xff] %v1078_v62  ;;  %v1081_v63 = vrot.slane %v1001_v29, %v269_v3  ;;  %v1085_v0 = vrot.slane %v949_v9, %v945_v7  ;;  %v376_v1 = vadd.f32 %v372_v45, %v317_v54 }
  0x22   : > { %1335 = vst [vmem:[#allocation6_spill] sm:$0xff] %v1063_v56  ;;  %v460_v2 = vmul.f32 %v1046_v49, %v1049_v50  ;;  %v489_v24 = vmul.f32 %v1075_v61, %v1052_v51  ;;  %v285_v25 = vmul.f32 %v1070_v58, %v1055_v52  ;;  %1339 = vst [vmem:[#allocation10_spill] sm:$0xff] %v1094_v30  ;;  %v1124_v51 = vld [vmem:[%s928_s21 + $0xe8] sm:$0xff]  ;;  %v1133_v50 = vld [vmem:[%s928_s21 + $0xd0] sm:$0xff] }
  0x23   : > { %1338 = vst [vmem:[#allocation9_spill] sm:$0xff] %v1081_v63  ;;  %v463_v3 = vadd.f32 %v459_v42, %v404_v59  ;;  %v314_v37 = vmul.f32 %v1066_v57, %v1085_v0  ;;  %v1100_v38 = vrot.slane %v960_v13, %v945_v7  ;;  %v1104_v41 = vrot.slane %v962_v14, %v945_v7  ;;  %v1112_v42 = vld [vmem:[%s928_s21 + $0xb0] sm:$0xff] }
  0x24   : > { %1340 = vst [vmem:[#allocation11_spill] sm:$0xff] %v1107_v44  ;;  %v405_v45 = vsub.f32 %v376_v1, %v401_v55  ;;  %v548_v46 = vmul.f32 %v1078_v62, %v1063_v56  ;;  %v1116_v54 = vrot.slane %v979_v20, %v945_v7  ;;  %v1120_v59 = vrot.slane %v981_v21, %v945_v7 }
  0x25   : > { %v492_v49 = vsub.f32 %v463_v3, %v488_v43  ;;  %1342 = vst [vmem:[#allocation13_spill] sm:$0xff] %v1124_v51  ;;  %v318_v55 = vsub.f32 %v285_v25, %v314_v37  ;;  %v373_v1 = vmul.f32 %v1094_v30, %v1100_v38  ;;  %v402_v62 = vmul.f32 %v1112_v42, %v1104_v41  ;;  %v1142_v25 = vld [vmem:[%s928_s21 + $0x18] sm:$0xff] }
  0x26   : > { %1341 = vst [vmem:[#allocation12_spill] sm:$0xff] %v1120_v59  ;;  %v464_v56 = vadd.f32 %v460_v2, %v405_v45  ;;  %v577_v61 = vmul.f32 %v1124_v51, %v1081_v63  ;;  %v461_v31 = vmul.f32 %v1107_v44, %v1116_v54  ;;  %v1139_v43 = vrot.slane %v999_v28, %v945_v7  ;;  %v1147_v2 = vld [vmem:[%s928_s21 + $0x70] sm:$0xff]  ;;  %v1150_v45 = vld [vmem:[%s928_s21 + $0x98] sm:$0xff] }
  0x27   : > { %v551_v3 = vadd.f32 %v547_v47, %v492_v49  ;;  %v377_v37 = vadd.f32 %v373_v1, %v318_v55  ;;  %v490_v30 = vmul.f32 %v1133_v50, %v1120_v59  ;;  %1344 = vst [vmem:[#allocation15_spill] sm:$0xff] %v1147_v2  ;;  %v1154_v63 = vrot.slane %v947_v8, %v1020_v36  ;;  %v1157_v44 = vld [vmem:[%s928_s21 + $0x38] sm:$0xff] }
  0x28   : > { %1343 = vst [vmem:[#allocation14_spill] sm:$0xff] %v1139_v43  ;;  %1345 = vst [vmem:[#allocation16_spill] sm:$0xff] %v1157_v44  ;;  %v493_v47 = vsub.f32 %v464_v56, %v489_v24  ;;  %v1166_v49 = vrot.slane %v949_v9, %v1020_v36  ;;  %v1170_v55 = vrot.slane %v960_v13, %v1020_v36 }
  0x29   : > { %v1174_v8 = vrot.slane %v962_v14, %v1020_v36  ;;  %v580_v1 = vsub.f32 %v551_v3, %v576_v60  ;;  %v406_v59 = vsub.f32 %v377_v37, %v402_v62  ;;  %v1178_v51 = vrot.slane %v1001_v29, %v945_v7  ;;  %v1187_v14 = vld [vmem:[%s928_s21 + $0xb8] sm:$0xff] }
  0x2a   : > { %v286_v56 = vmul.f32 %v1154_v63, %v1142_v25  ;;  %v552_v9 = vadd.f32 %v548_v46, %v493_v47  ;;  %v549_v24 = vmul.f32 %v1147_v2, %v1139_v43  ;;  %v315_v13 = vmul.f32 %v1150_v45, %v1166_v49  ;;  %v1195_v46 = vld [vmem:[%s928_s21 + $0x58] sm:$0xff]  ;;  %v1206_v2 = vld [vmem:[%s928_s21 + $0xf0] sm:$0xff] }
  0x2b   : > { %v374_v60 = vmul.f32 %v1157_v44, %v1170_v55  ;;  %600 = vst [vmem:[%s1162_s30] sm:$0xff] %v580_v1  ;;  %v465_v7 = vadd.f32 %v461_v31, %v406_v59  ;;  %v403_v62 = vmul.f32 %v1187_v14, %v1174_v8  ;;  %v1199_v3 = vrot.slane %v979_v20, %v1020_v36  ;;  %v1217_v44 = vld [vmem:[%s928_s21 + $0x78] sm:$0xff] }
  0x2c   : > { %v1203_v37 = vrot.slane %v981_v21, %v1020_v36  ;;  %v581_v47 = vsub.f32 %v552_v9, %v577_v61  ;;  %v319_v43 = vsub.f32 %v286_v56, %v315_v13  ;;  %v1210_v31 = vrot.slane %v999_v28, %v1020_v36  ;;  %v782_v56 = vld [vmem:[%s928_s21 + $0xd8] sm:$0xff] }
  0x2d   : > { %v320_v59 = vmul.f32 %v940_v5, %v955_v11  ;;  %v494_v1 = vsub.f32 %v465_v7, %v490_v30  ;;  %v578_v20 = vmul.f32 %v1206_v2, %v1178_v51  ;;  %v1221_v21 = vrot.slane %v1001_v29, %v1020_v36  ;;  %v792_v7 = vld [vmem:[%s928_s21 + $0xf8] sm:$0xff] }
  0x2e   : > { %601 = vst [vmem:[%s1162_s30 + $0x8] sm:$0xff] %v581_v47  ;;  %v378_v61 = vadd.f32 %v374_v60, %v319_v43  ;;  %v462_v28 = vmul.f32 %v1195_v46, %v1199_v3  ;;  %v328_v5 = vmul.f32 %v958_v12, %v937_v4  ;;  %v408_v11 = vmul.f32 %v971_v17, %v974_v18 }
  0x2f   : > { %v553_v30 = vadd.f32 %v549_v24, %v494_v1  ;;  %v491_v9 = vmul.f32 %v782_v56, %v1203_v37  ;;  %v550_v29 = vmul.f32 %v1217_v44, %v1210_v31  ;;  %v416_v43 = vmul.f32 %v943_v6, %v977_v19 }
  0x30   : > { %v407_v13 = vsub.f32 %v378_v61, %v403_v62  ;;  %v332_v36 = vadd.f32 %v328_v5, %v320_v59  ;;  %v321_v4 = vmul.f32 %v1012_v33, %v968_v16  ;;  %v329_v12 = vmul.f32 %v984_v22, %v952_v10  ;;  %v1350_v61 = vld [vmem:[#allocation5_spill] sm:$0xff] }
  0x31   : > { %v582_v60 = vsub.f32 %v553_v30, %v578_v20  ;;  %v409_v17 = vmul.f32 %v1043_v48, %v987_v23  ;;  %v579_v24 = vmul.f32 %v792_v7, %v1221_v21  ;;  %v496_v47 = vmul.f32 %v1025_v39, %v994_v26  ;;  %v1346_v26 = vld [vmem:[#allocation2_spill] sm:$0xff] }
  0x32   : > { %v466_v18 = vadd.f32 %v462_v28, %v407_v13  ;;  %v412_v62 = vadd.f32 %v408_v11, %v332_v36  ;;  %v504_v6 = vmul.f32 %v965_v15, %v997_v27  ;;  %v584_v16 = vmul.f32 %v1058_v53, %v1009_v32  ;;  %v1347_v15 = vld [vmem:[#allocation4_spill] sm:$0xff]  ;;  %v1348_v27 = vld [vmem:[#allocation7_spill] sm:$0xff]  ;;  %v1349_v20 = vld [vmem:[#allocation10_spill] sm:$0xff] }
  0x33   : > { %602 = vst [vmem:[%s1162_s30 + $0x10] sm:$0xff] %v582_v60  ;;  %v333_v19 = vadd.f32 %v329_v12, %v321_v4  ;;  %v417_v10 = vmul.f32 %v1015_v34, %v1018_v35  ;;  %v322_v33 = vmul.f32 %v1066_v57, %v1070_v58  ;;  %v330_v48 = vmul.f32 %v1085_v0, %v1055_v52  ;;  %v1351_v52 = vld [vmem:[#allocation3_spill] sm:$0xff]  ;;  %v1353_v13 = vld [vmem:[#allocation13_spill] sm:$0xff]  ;;  %v1356_v60 = vld [vmem:[#allocation16_spill] sm:$0xff] }
  0x34   : > { %v495_v22 = vsub.f32 %v466_v18, %v491_v9  ;;  %v420_v23 = vadd.f32 %v416_v43, %v412_v62  ;;  %v592_v39 = vmul.f32 %v1346_v26, %v1028_v40  ;;  %v497_v1 = vmul.f32 %v1348_v27, %v1347_v15  ;;  %v1352_v9 = vld [vmem:[#allocation6_spill] sm:$0xff]  ;;  %v1355_v36 = vld [vmem:[#allocation11_spill] sm:$0xff] }
  0x35   : > { %v413_v59 = vadd.f32 %v409_v17, %v333_v19  ;;  %v410_v32 = vmul.f32 %v1112_v42, %v1100_v38  ;;  %v334_v35 = vadd.f32 %v330_v48, %v322_v33  ;;  %v418_v57 = vmul.f32 %v1349_v20, %v1104_v41  ;;  %v1359_v18 = vld [vmem:[#allocation14_spill] sm:$0xff] }
  0x36   : > { %v554_v53 = vadd.f32 %v550_v29, %v495_v22  ;;  %v500_v34 = vadd.f32 %v496_v47, %v420_v23  ;;  %v505_v0 = vmul.f32 %v1351_v52, %v1350_v61  ;;  %v498_v40 = vmul.f32 %v1133_v50, %v1116_v54  ;;  %v1354_v29 = vld [vmem:[#allocation12_spill] sm:$0xff] }
  0x37   : > { %v421_v58 = vadd.f32 %v417_v10, %v413_v59  ;;  %v323_v28 = vmul.f32 %v1150_v45, %v1154_v63  ;;  %v414_v38 = vadd.f32 %v410_v32, %v334_v35  ;;  %v331_v42 = vmul.f32 %v1166_v49, %v1142_v25  ;;  %v1357_v25 = vld [vmem:[#allocation9_spill] sm:$0xff]  ;;  %v1358_v49 = vld [vmem:[#allocation8_spill] sm:$0xff] }
  0x38   : > { %v583_v5 = vsub.f32 %v554_v53, %v579_v24  ;;  %v508_v11 = vadd.f32 %v504_v6, %v500_v34  ;;  %v585_v41 = vmul.f32 %v1353_v13, %v1352_v9  ;;  %v506_v43 = vmul.f32 %v1355_v36, %v1354_v29 }
  0x39   : > { %v501_v30 = vadd.f32 %v497_v1, %v421_v58  ;;  %v411_v50 = vmul.f32 %v1187_v14, %v1170_v55  ;;  %v422_v63 = vadd.f32 %v418_v57, %v414_v38  ;;  %v335_v45 = vadd.f32 %v331_v42, %v323_v28 }
  0x3a   : > { %603 = vst [vmem:[%s1162_s30 + $0x18] sm:$0xff] %v583_v5  ;;  %v588_v54 = vadd.f32 %v584_v16, %v508_v11  ;;  %v419_v4 = vmul.f32 %v1356_v60, %v1174_v8  ;;  %v593_v17 = vmul.f32 %v1358_v49, %v1357_v25  ;;  %v586_v24 = vmul.f32 %v1206_v2, %v1359_v18  ;;  %v1360_v8 = vld [vmem:[#allocation15_spill] sm:$0xff] }
  0x3b   : > { %v509_v12 = vadd.f32 %v505_v0, %v501_v30  ;;  %v502_v47 = vadd.f32 %v498_v40, %v422_v63  ;;  %v415_v6 = vadd.f32 %v411_v50, %v335_v45  ;;  %v499_v55 = vmul.f32 %v782_v56, %v1199_v3 }
  0x3c   : > { %v596_v62 = vadd.f32 %v592_v39, %v588_v54  ;;  %v594_v19 = vmul.f32 %v1360_v8, %v1178_v51  ;;  %v507_v22 = vmul.f32 %v1195_v46, %v1203_v37  ;;  %v587_v48 = vmul.f32 %v792_v7, %v1210_v31 }
  0x3d   : > { %v589_v14 = vadd.f32 %v585_v41, %v509_v12  ;;  %v510_v16 = vadd.f32 %v506_v43, %v502_v47  ;;  %v423_v10 = vadd.f32 %v419_v4, %v415_v6  ;;  %v595_v3 = vmul.f32 %v1217_v44, %v1221_v21 }
  0x3e   : > { %793 = vst [vmem:[%s1162_s30 + $0x20] sm:$0xff] %v596_v62 }
  0x3f   : > { %v597_v23 = vadd.f32 %v593_v17, %v589_v14  ;;  %v590_v33 = vadd.f32 %v586_v24, %v510_v16  ;;  %v503_v2 = vadd.f32 %v499_v55, %v423_v10 }
  0x41   : > { %794 = vst [vmem:[%s1162_s30 + $0x28] sm:$0xff] %v597_v23  ;;  %v598_v26 = vadd.f32 %v594_v19, %v590_v33  ;;  %v511_v39 = vadd.f32 %v507_v22, %v503_v2 }
  0x43   : > { %795 = vst [vmem:[%s1162_s30 + $0x30] sm:$0xff] %v598_v26  ;;  %v591_v56 = vadd.f32 %v587_v48, %v511_v39 }
  0x45   : > { %v599_v59 = vadd.f32 %v595_v3, %v591_v56 }
  0x47   : > { %796 = vst [vmem:[%s1162_s30 + $0x38] sm:$0xff] %v599_v59 }
  0x48 PF: > { %s12_s13 = sadd.s32 1, %s878_s13   ;;  %s1361_s9 = smov %s870_s11 }
  0x49   : > { %p9_p7 = scmp.ge.s32.totalorder %s12_s13, 10   ;;  %s1362_s10 = smov %s874_s12 }
  0x4a   : > { %s1363_s11 = smov %s1366_s14  ;;  %s1364_s12 = smov %s1370_s15 }
  0x4b   :  { %11 = sbr.rel (!%p9_p7) target bundleno = 3 (0x3), region = 76 }

// kernel: reverse.1
= control target key start
LH: loop header
LB: loop body
LE: loop exit
PB: predicated region body
PF: predicated region fallthrough
CT: control target
= control target key end

     0   :  { %s2696_s0 = inlined_call_operand.vmem [shape: f32[2,8,16,16,7], index: 0, kind: input, shape index: {}]   ;;  %s2697_s1 = inlined_call_operand.vmem [shape: f32[2,8,16,16,7], index: 1, kind: output, shape index: {}]  }
   0x1   :  { %v896_v0 = vld [vmem:[%s2696_s0 + $0x60] sm:$0xff]  ;;  %v899_v2 = vld [vmem:[%s2696_s0 + $0xd0] sm:$0xff] }
   0x2   :  { %v897_v1 = vld [vmem:[%s2696_s0 + $0x3e0] sm:$0xff]  ;;  %4 = vst [vmem:[%s2697_s1] sm:$0xff] %v896_v0  ;;  %900 = vst [vmem:[%s2697_s1 + $0x70] sm:$0xff] %v899_v2  ;;  %v901_v3 = vld [vmem:[%s2696_s0 + $0x450] sm:$0xff] }
   0x3   :  { %898 = vst [vmem:[%s2697_s1 + $0x380] sm:$0xff] %v897_v1  ;;  %v903_v4 = vld [vmem:[%s2696_s0 + $0x140] sm:$0xff]  ;;  %902 = vst [vmem:[%s2697_s1 + $0x3f0] sm:$0xff] %v901_v3  ;;  %v907_v6 = vld [vmem:[%s2696_s0 + $0x1b0] sm:$0xff] }
   0x4   :  { %v905_v5 = vld [vmem:[%s2696_s0 + $0x4c0] sm:$0xff]  ;;  %904 = vst [vmem:[%s2697_s1 + $0xe0] sm:$0xff] %v903_v4  ;;  %v909_v7 = vld [vmem:[%s2696_s0 + $0x530] sm:$0xff]  ;;  %908 = vst [vmem:[%s2697_s1 + $0x150] sm:$0xff] %v907_v6 }
   0x5   :  { %906 = vst [vmem:[%s2697_s1 + $0x460] sm:$0xff] %v905_v5  ;;  %v911_v8 = vld [vmem:[%s2696_s0 + $0x220] sm:$0xff]  ;;  %910 = vst [vmem:[%s2697_s1 + $0x4d0] sm:$0xff] %v909_v7  ;;  %v915_v10 = vld [vmem:[%s2696_s0 + $0x290] sm:$0xff] }
   0x6   :  { %912 = vst [vmem:[%s2697_s1 + $0x1c0] sm:$0xff] %v911_v8  ;;  %v913_v9 = vld [vmem:[%s2696_s0 + $0x5a0] sm:$0xff]  ;;  %v917_v11 = vld [vmem:[%s2696_s0 + $0x610] sm:$0xff]  ;;  %916 = vst [vmem:[%s2697_s1 + $0x230] sm:$0xff] %v915_v10 }
   0x7   :  { %914 = vst [vmem:[%s2697_s1 + $0x540] sm:$0xff] %v913_v9  ;;  %918 = vst [vmem:[%s2697_s1 + $0x5b0] sm:$0xff] %v917_v11  ;;  %v919_v12 = vld [vmem:[%s2696_s0 + $0x300] sm:$0xff]  ;;  %v923_v14 = vld [vmem:[%s2696_s0 + $0x370] sm:$0xff] }
   0x8   :  { %v921_v13 = vld [vmem:[%s2696_s0 + $0x680] sm:$0xff]  ;;  %920 = vst [vmem:[%s2697_s1 + $0x2a0] sm:$0xff] %v919_v12  ;;  %924 = vst [vmem:[%s2697_s1 + $0x310] sm:$0xff] %v923_v14  ;;  %v925_v15 = vld [vmem:[%s2696_s0 + $0x6f0] sm:$0xff] }
   0x9   :  { %922 = vst [vmem:[%s2697_s1 + $0x620] sm:$0xff] %v921_v13  ;;  %v927_v16 = vld [vmem:[%s2696_s0 + $0x50] sm:$0xff]  ;;  %926 = vst [vmem:[%s2697_s1 + $0x690] sm:$0xff] %v925_v15  ;;  %v931_v18 = vld [vmem:[%s2696_s0 + $0xc0] sm:$0xff] }
   0xa   :  { %v929_v17 = vld [vmem:[%s2696_s0 + $0x3d0] sm:$0xff]  ;;  %928 = vst [vmem:[%s2697_s1 + $0x10] sm:$0xff] %v927_v16  ;;  %v933_v19 = vld [vmem:[%s2696_s0 + $0x440] sm:$0xff]  ;;  %932 = vst [vmem:[%s2697_s1 + $0x80] sm:$0xff] %v931_v18 }
   0xb   :  { %930 = vst [vmem:[%s2697_s1 + $0x390] sm:$0xff] %v929_v17  ;;  %v935_v20 = vld [vmem:[%s2696_s0 + $0x130] sm:$0xff]  ;;  %934 = vst [vmem:[%s2697_s1 + $0x400] sm:$0xff] %v933_v19  ;;  %v939_v22 = vld [vmem:[%s2696_s0 + $0x1a0] sm:$0xff] }
   0xc   :  { %936 = vst [vmem:[%s2697_s1 + $0xf0] sm:$0xff] %v935_v20  ;;  %v937_v21 = vld [vmem:[%s2696_s0 + $0x4b0] sm:$0xff]  ;;  %v941_v23 = vld [vmem:[%s2696_s0 + $0x520] sm:$0xff]  ;;  %940 = vst [vmem:[%s2697_s1 + $0x160] sm:$0xff] %v939_v22 }
   0xd   :  { %938 = vst [vmem:[%s2697_s1 + $0x470] sm:$0xff] %v937_v21  ;;  %942 = vst [vmem:[%s2697_s1 + $0x4e0] sm:$0xff] %v941_v23  ;;  %v943_v24 = vld [vmem:[%s2696_s0 + $0x210] sm:$0xff]  ;;  %v947_v26 = vld [vmem:[%s2696_s0 + $0x280] sm:$0xff] }
   0xe   :  { %v945_v25 = vld [vmem:[%s2696_s0 + $0x590] sm:$0xff]  ;;  %944 = vst [vmem:[%s2697_s1 + $0x1d0] sm:$0xff] %v943_v24  ;;  %948 = vst [vmem:[%s2697_s1 + $0x240] sm:$0xff] %v947_v26  ;;  %v949_v27 = vld [vmem:[%s2696_s0 + $0x600] sm:$0xff] }
   0xf   :  { %946 = vst [vmem:[%s2697_s1 + $0x550] sm:$0xff] %v945_v25  ;;  %v951_v28 = vld [vmem:[%s2696_s0 + $0x2f0] sm:$0xff]  ;;  %950 = vst [vmem:[%s2697_s1 + $0x5c0] sm:$0xff] %v949_v27  ;;  %v955_v30 = vld [vmem:[%s2696_s0 + $0x360] sm:$0xff] }
  0x10   :  { %v953_v29 = vld [vmem:[%s2696_s0 + $0x670] sm:$0xff]  ;;  %952 = vst [vmem:[%s2697_s1 + $0x2b0] sm:$0xff] %v951_v28  ;;  %v957_v31 = vld [vmem:[%s2696_s0 + $0x6e0] sm:$0xff]  ;;  %956 = vst [vmem:[%s2697_s1 + $0x320] sm:$0xff] %v955_v30 }
  0x11   :  { %954 = vst [vmem:[%s2697_s1 + $0x630] sm:$0xff] %v953_v29  ;;  %v959_v32 = vld [vmem:[%s2696_s0 + $0x40] sm:$0xff]  ;;  %958 = vst [vmem:[%s2697_s1 + $0x6a0] sm:$0xff] %v957_v31  ;;  %v963_v34 = vld [vmem:[%s2696_s0 + $0xb0] sm:$0xff] }
  0x12   :  { %960 = vst [vmem:[%s2697_s1 + $0x20] sm:$0xff] %v959_v32  ;;  %v961_v33 = vld [vmem:[%s2696_s0 + $0x3c0] sm:$0xff]  ;;  %v965_v35 = vld [vmem:[%s2696_s0 + $0x430] sm:$0xff]  ;;  %964 = vst [vmem:[%s2697_s1 + $0x90] sm:$0xff] %v963_v34 }
  0x13   :  { %962 = vst [vmem:[%s2697_s1 + $0x3a0] sm:$0xff] %v961_v33  ;;  %966 = vst [vmem:[%s2697_s1 + $0x410] sm:$0xff] %v965_v35  ;;  %v967_v36 = vld [vmem:[%s2696_s0 + $0x120] sm:$0xff]  ;;  %v971_v38 = vld [vmem:[%s2696_s0 + $0x190] sm:$0xff] }
  0x14   :  { %v969_v37 = vld [vmem:[%s2696_s0 + $0x4a0] sm:$0xff]  ;;  %968 = vst [vmem:[%s2697_s1 + $0x100] sm:$0xff] %v967_v36  ;;  %972 = vst [vmem:[%s2697_s1 + $0x170] sm:$0xff] %v971_v38  ;;  %v973_v39 = vld [vmem:[%s2696_s0 + $0x510] sm:$0xff] }
  0x15   :  { %970 = vst [vmem:[%s2697_s1 + $0x480] sm:$0xff] %v969_v37  ;;  %v975_v40 = vld [vmem:[%s2696_s0 + $0x200] sm:$0xff]  ;;  %974 = vst [vmem:[%s2697_s1 + $0x4f0] sm:$0xff] %v973_v39  ;;  %v979_v42 = vld [vmem:[%s2696_s0 + $0x270] sm:$0xff] }
  0x16   :  { %v977_v41 = vld [vmem:[%s2696_s0 + $0x580] sm:$0xff]  ;;  %976 = vst [vmem:[%s2697_s1 + $0x1e0] sm:$0xff] %v975_v40  ;;  %v981_v43 = vld [vmem:[%s2696_s0 + $0x5f0] sm:$0xff]  ;;  %980 = vst [vmem:[%s2697_s1 + $0x250] sm:$0xff] %v979_v42 }
  0x17   :  { %978 = vst [vmem:[%s2697_s1 + $0x560] sm:$0xff] %v977_v41  ;;  %v983_v44 = vld [vmem:[%s2696_s0 + $0x2e0] sm:$0xff]  ;;  %982 = vst [vmem:[%s2697_s1 + $0x5d0] sm:$0xff] %v981_v43  ;;  %v987_v46 = vld [vmem:[%s2696_s0 + $0x350] sm:$0xff] }
  0x18   :  { %984 = vst [vmem:[%s2697_s1 + $0x2c0] sm:$0xff] %v983_v44  ;;  %v985_v45 = vld [vmem:[%s2696_s0 + $0x660] sm:$0xff]  ;;  %v989_v47 = vld [vmem:[%s2696_s0 + $0x6d0] sm:$0xff]  ;;  %988 = vst [vmem:[%s2697_s1 + $0x330] sm:$0xff] %v987_v46 }
  0x19   :  { %986 = vst [vmem:[%s2697_s1 + $0x640] sm:$0xff] %v985_v45  ;;  %990 = vst [vmem:[%s2697_s1 + $0x6b0] sm:$0xff] %v989_v47  ;;  %v991_v48 = vld [vmem:[%s2696_s0 + $0x30] sm:$0xff]  ;;  %v995_v50 = vld [vmem:[%s2696_s0 + $0xa0] sm:$0xff] }
  0x1a   :  { %v993_v49 = vld [vmem:[%s2696_s0 + $0x3b0] sm:$0xff]  ;;  %992 = vst [vmem:[%s2697_s1 + $0x30] sm:$0xff] %v991_v48  ;;  %996 = vst [vmem:[%s2697_s1 + $0xa0] sm:$0xff] %v995_v50  ;;  %v997_v51 = vld [vmem:[%s2696_s0 + $0x420] sm:$0xff] }
  0x1b   :  { %994 = vst [vmem:[%s2697_s1 + $0x3b0] sm:$0xff] %v993_v49  ;;  %v999_v52 = vld [vmem:[%s2696_s0 + $0x110] sm:$0xff]  ;;  %998 = vst [vmem:[%s2697_s1 + $0x420] sm:$0xff] %v997_v51  ;;  %v1003_v54 = vld [vmem:[%s2696_s0 + $0x180] sm:$0xff] }
  0x1c   :  { %v1001_v53 = vld [vmem:[%s2696_s0 + $0x490] sm:$0xff]  ;;  %1000 = vst [vmem:[%s2697_s1 + $0x110] sm:$0xff] %v999_v52  ;;  %v1005_v55 = vld [vmem:[%s2696_s0 + $0x500] sm:$0xff]  ;;  %1004 = vst [vmem:[%s2697_s1 + $0x180] sm:$0xff] %v1003_v54 }
  0x1d   :  { %1002 = vst [vmem:[%s2697_s1 + $0x490] sm:$0xff] %v1001_v53  ;;  %v1007_v56 = vld [vmem:[%s2696_s0 + $0x1f0] sm:$0xff]  ;;  %1006 = vst [vmem:[%s2697_s1 + $0x500] sm:$0xff] %v1005_v55  ;;  %v1011_v58 = vld [vmem:[%s2696_s0 + $0x260] sm:$0xff] }
  0x1e   :  { %1008 = vst [vmem:[%s2697_s1 + $0x1f0] sm:$0xff] %v1007_v56  ;;  %v1009_v57 = vld [vmem:[%s2696_s0 + $0x570] sm:$0xff]  ;;  %v1013_v59 = vld [vmem:[%s2696_s0 + $0x5e0] sm:$0xff]  ;;  %1012 = vst [vmem:[%s2697_s1 + $0x260] sm:$0xff] %v1011_v58 }
  0x1f   :  { %1010 = vst [vmem:[%s2697_s1 + $0x570] sm:$0xff] %v1009_v57  ;;  %1014 = vst [vmem:[%s2697_s1 + $0x5e0] sm:$0xff] %v1013_v59  ;;  %v1015_v60 = vld [vmem:[%s2696_s0 + $0x2d0] sm:$0xff]  ;;  %v1019_v62 = vld [vmem:[%s2696_s0 + $0x340] sm:$0xff] }
  0x20   :  { %v1017_v61 = vld [vmem:[%s2696_s0 + $0x650] sm:$0xff]  ;;  %1016 = vst [vmem:[%s2697_s1 + $0x2d0] sm:$0xff] %v1015_v60  ;;  %1020 = vst [vmem:[%s2697_s1 + $0x340] sm:$0xff] %v1019_v62  ;;  %v1021_v63 = vld [vmem:[%s2696_s0 + $0x6c0] sm:$0xff] }
  0x21   :  { %1018 = vst [vmem:[%s2697_s1 + $0x650] sm:$0xff] %v1017_v61  ;;  %v1023_v0 = vld [vmem:[%s2696_s0 + $0x20] sm:$0xff]  ;;  %1022 = vst [vmem:[%s2697_s1 + $0x6c0] sm:$0xff] %v1021_v63  ;;  %v1027_v2 = vld [vmem:[%s2696_s0 + $0x90] sm:$0xff] }
  0x22   :  { %v1025_v1 = vld [vmem:[%s2696_s0 + $0x3a0] sm:$0xff]  ;;  %1024 = vst [vmem:[%s2697_s1 + $0x40] sm:$0xff] %v1023_v0  ;;  %v1029_v3 = vld [vmem:[%s2696_s0 + $0x410] sm:$0xff]  ;;  %1028 = vst [vmem:[%s2697_s1 + $0xb0] sm:$0xff] %v1027_v2 }
  0x23   :  { %1026 = vst [vmem:[%s2697_s1 + $0x3c0] sm:$0xff] %v1025_v1  ;;  %v1031_v4 = vld [vmem:[%s2696_s0 + $0x100] sm:$0xff]  ;;  %1030 = vst [vmem:[%s2697_s1 + $0x430] sm:$0xff] %v1029_v3  ;;  %v1035_v6 = vld [vmem:[%s2696_s0 + $0x170] sm:$0xff] }
  0x24   :  { %1032 = vst [vmem:[%s2697_s1 + $0x120] sm:$0xff] %v1031_v4  ;;  %v1033_v5 = vld [vmem:[%s2696_s0 + $0x480] sm:$0xff]  ;;  %v1037_v7 = vld [vmem:[%s2696_s0 + $0x4f0] sm:$0xff]  ;;  %1036 = vst [vmem:[%s2697_s1 + $0x190] sm:$0xff] %v1035_v6 }
  0x25   :  { %1034 = vst [vmem:[%s2697_s1 + $0x4a0] sm:$0xff] %v1033_v5  ;;  %1038 = vst [vmem:[%s2697_s1 + $0x510] sm:$0xff] %v1037_v7  ;;  %v1039_v8 = vld [vmem:[%s2696_s0 + $0x1e0] sm:$0xff]  ;;  %v1043_v10 = vld [vmem:[%s2696_s0 + $0x250] sm:$0xff] }
  0x26   :  { %v1041_v9 = vld [vmem:[%s2696_s0 + $0x560] sm:$0xff]  ;;  %1040 = vst [vmem:[%s2697_s1 + $0x200] sm:$0xff] %v1039_v8  ;;  %1044 = vst [vmem:[%s2697_s1 + $0x270] sm:$0xff] %v1043_v10  ;;  %v1045_v11 = vld [vmem:[%s2696_s0 + $0x5d0] sm:$0xff] }
  0x27   :  { %1042 = vst [vmem:[%s2697_s1 + $0x580] sm:$0xff] %v1041_v9  ;;  %v1047_v12 = vld [vmem:[%s2696_s0 + $0x2c0] sm:$0xff]  ;;  %1046 = vst [vmem:[%s2697_s1 + $0x5f0] sm:$0xff] %v1045_v11  ;;  %v1051_v14 = vld [vmem:[%s2696_s0 + $0x330] sm:$0xff] }
  0x28   :  { %v1049_v13 = vld [vmem:[%s2696_s0 + $0x640] sm:$0xff]  ;;  %1048 = vst [vmem:[%s2697_s1 + $0x2e0] sm:$0xff] %v1047_v12  ;;  %v1053_v15 = vld [vmem:[%s2696_s0 + $0x6b0] sm:$0xff]  ;;  %1052 = vst [vmem:[%s2697_s1 + $0x350] sm:$0xff] %v1051_v14 }
  0x29   :  { %1050 = vst [vmem:[%s2697_s1 + $0x660] sm:$0xff] %v1049_v13  ;;  %v1055_v16 = vld [vmem:[%s2696_s0 + $0x10] sm:$0xff]  ;;  %1054 = vst [vmem:[%s2697_s1 + $0x6d0] sm:$0xff] %v1053_v15  ;;  %v1059_v18 = vld [vmem:[%s2696_s0 + $0x80] sm:$0xff] }
  0x2a   :  { %1056 = vst [vmem:[%s2697_s1 + $0x50] sm:$0xff] %v1055_v16  ;;  %v1057_v17 = vld [vmem:[%s2696_s0 + $0x390] sm:$0xff]  ;;  %v1061_v19 = vld [vmem:[%s2696_s0 + $0x400] sm:$0xff]  ;;  %1060 = vst [vmem:[%s2697_s1 + $0xc0] sm:$0xff] %v1059_v18 }
  0x2b   :  { %1058 = vst [vmem:[%s2697_s1 + $0x3d0] sm:$0xff] %v1057_v17  ;;  %1062 = vst [vmem:[%s2697_s1 + $0x440] sm:$0xff] %v1061_v19  ;;  %v1063_v20 = vld [vmem:[%s2696_s0 + $0xf0] sm:$0xff]  ;;  %v1067_v22 = vld [vmem:[%s2696_s0 + $0x160] sm:$0xff] }
  0x2c   :  { %v1065_v21 = vld [vmem:[%s2696_s0 + $0x470] sm:$0xff]  ;;  %1064 = vst [vmem:[%s2697_s1 + $0x130] sm:$0xff] %v1063_v20  ;;  %1068 = vst [vmem:[%s2697_s1 + $0x1a0] sm:$0xff] %v1067_v22  ;;  %v1069_v23 = vld [vmem:[%s2696_s0 + $0x4e0] sm:$0xff] }
  0x2d   :  { %1066 = vst [vmem:[%s2697_s1 + $0x4b0] sm:$0xff] %v1065_v21  ;;  %v1071_v24 = vld [vmem:[%s2696_s0 + $0x1d0] sm:$0xff]  ;;  %1070 = vst [vmem:[%s2697_s1 + $0x520] sm:$0xff] %v1069_v23  ;;  %v1075_v26 = vld [vmem:[%s2696_s0 + $0x240] sm:$0xff] }
  0x2e   :  { %v1073_v25 = vld [vmem:[%s2696_s0 + $0x550] sm:$0xff]  ;;  %1072 = vst [vmem:[%s2697_s1 + $0x210] sm:$0xff] %v1071_v24  ;;  %v1077_v27 = vld [vmem:[%s2696_s0 + $0x5c0] sm:$0xff]  ;;  %1076 = vst [vmem:[%s2697_s1 + $0x280] sm:$0xff] %v1075_v26 }
  0x2f   :  { %1074 = vst [vmem:[%s2697_s1 + $0x590] sm:$0xff] %v1073_v25  ;;  %v1079_v28 = vld [vmem:[%s2696_s0 + $0x2b0] sm:$0xff]  ;;  %1078 = vst [vmem:[%s2697_s1 + $0x600] sm:$0xff] %v1077_v27  ;;  %v1083_v30 = vld [vmem:[%s2696_s0 + $0x320] sm:$0xff] }
  0x30   :  { %1080 = vst [vmem:[%s2697_s1 + $0x2f0] sm:$0xff] %v1079_v28  ;;  %v1081_v29 = vld [vmem:[%s2696_s0 + $0x630] sm:$0xff]  ;;  %v1085_v31 = vld [vmem:[%s2696_s0 + $0x6a0] sm:$0xff]  ;;  %1084 = vst [vmem:[%s2697_s1 + $0x360] sm:$0xff] %v1083_v30 }
  0x31   :  { %1082 = vst [vmem:[%s2697_s1 + $0x670] sm:$0xff] %v1081_v29  ;;  %1086 = vst [vmem:[%s2697_s1 + $0x6e0] sm:$0xff] %v1085_v31  ;;  %v385_v32 = vld [vmem:[%s2696_s0] sm:$0xff]  ;;  %v1090_v34 = vld [vmem:[%s2696_s0 + $0x70] sm:$0xff] }
  0x32   :  { %v1088_v33 = vld [vmem:[%s2696_s0 + $0x380] sm:$0xff]  ;;  %1087 = vst [vmem:[%s2697_s1 + $0x60] sm:$0xff] %v385_v32  ;;  %1091 = vst [vmem:[%s2697_s1 + $0xd0] sm:$0xff] %v1090_v34  ;;  %v1092_v35 = vld [vmem:[%s2696_s0 + $0x3f0] sm:$0xff] }
  0x33   :  { %1089 = vst [vmem:[%s2697_s1 + $0x3e0] sm:$0xff] %v1088_v33  ;;  %v1094_v36 = vld [vmem:[%s2696_s0 + $0xe0] sm:$0xff]  ;;  %1093 = vst [vmem:[%s2697_s1 + $0x450] sm:$0xff] %v1092_v35  ;;  %v1098_v38 = vld [vmem:[%s2696_s0 + $0x150] sm:$0xff] }
  0x34   :  { %v1096_v37 = vld [vmem:[%s2696_s0 + $0x460] sm:$0xff]  ;;  %1095 = vst [vmem:[%s2697_s1 + $0x140] sm:$0xff] %v1094_v36  ;;  %v1100_v39 = vld [vmem:[%s2696_s0 + $0x4d0] sm:$0xff]  ;;  %1099 = vst [vmem:[%s2697_s1 + $0x1b0] sm:$0xff] %v1098_v38 }
  0x35   :  { %1097 = vst [vmem:[%s2697_s1 + $0x4c0] sm:$0xff] %v1096_v37  ;;  %v1102_v40 = vld [vmem:[%s2696_s0 + $0x1c0] sm:$0xff]  ;;  %1101 = vst [vmem:[%s2697_s1 + $0x530] sm:$0xff] %v1100_v39  ;;  %v1106_v42 = vld [vmem:[%s2696_s0 + $0x230] sm:$0xff] }
  0x36   :  { %1103 = vst [vmem:[%s2697_s1 + $0x220] sm:$0xff] %v1102_v40  ;;  %v1104_v41 = vld [vmem:[%s2696_s0 + $0x540] sm:$0xff]  ;;  %v1108_v43 = vld [vmem:[%s2696_s0 + $0x5b0] sm:$0xff]  ;;  %1107 = vst [vmem:[%s2697_s1 + $0x290] sm:$0xff] %v1106_v42 }
  0x37   :  { %1105 = vst [vmem:[%s2697_s1 + $0x5a0] sm:$0xff] %v1104_v41  ;;  %1109 = vst [vmem:[%s2697_s1 + $0x610] sm:$0xff] %v1108_v43  ;;  %v1110_v44 = vld [vmem:[%s2696_s0 + $0x2a0] sm:$0xff]  ;;  %v1114_v46 = vld [vmem:[%s2696_s0 + $0x310] sm:$0xff] }
  0x38   :  { %v1112_v45 = vld [vmem:[%s2696_s0 + $0x620] sm:$0xff]  ;;  %1111 = vst [vmem:[%s2697_s1 + $0x300] sm:$0xff] %v1110_v44  ;;  %1115 = vst [vmem:[%s2697_s1 + $0x370] sm:$0xff] %v1114_v46  ;;  %v1116_v47 = vld [vmem:[%s2696_s0 + $0x690] sm:$0xff] }
  0x39   :  { %1113 = vst [vmem:[%s2697_s1 + $0x680] sm:$0xff] %v1112_v45  ;;  %v1118_v48 = vld [vmem:[%s2696_s0 + $0x68] sm:$0xff]  ;;  %1117 = vst [vmem:[%s2697_s1 + $0x6f0] sm:$0xff] %v1116_v47  ;;  %v1122_v50 = vld [vmem:[%s2696_s0 + $0xd8] sm:$0xff] }
  0x3a   :  { %v1120_v49 = vld [vmem:[%s2696_s0 + $0x3e8] sm:$0xff]  ;;  %1119 = vst [vmem:[%s2697_s1 + $0x8] sm:$0xff] %v1118_v48  ;;  %v1124_v51 = vld [vmem:[%s2696_s0 + $0x458] sm:$0xff]  ;;  %1123 = vst [vmem:[%s2697_s1 + $0x78] sm:$0xff] %v1122_v50 }
  0x3b   :  { %1121 = vst [vmem:[%s2697_s1 + $0x388] sm:$0xff] %v1120_v49  ;;  %v1126_v52 = vld [vmem:[%s2696_s0 + $0x148] sm:$0xff]  ;;  %1125 = vst [vmem:[%s2697_s1 + $0x3f8] sm:$0xff] %v1124_v51  ;;  %v1130_v54 = vld [vmem:[%s2696_s0 + $0x1b8] sm:$0xff] }
  0x3c   :  { %1127 = vst [vmem:[%s2697_s1 + $0xe8] sm:$0xff] %v1126_v52  ;;  %v1128_v53 = vld [vmem:[%s2696_s0 + $0x4c8] sm:$0xff]  ;;  %v1132_v55 = vld [vmem:[%s2696_s0 + $0x538] sm:$0xff]  ;;  %1131 = vst [vmem:[%s2697_s1 + $0x158] sm:$0xff] %v1130_v54 }
  0x3d   :  { %1129 = vst [vmem:[%s2697_s1 + $0x468] sm:$0xff] %v1128_v53  ;;  %1133 = vst [vmem:[%s2697_s1 + $0x4d8] sm:$0xff] %v1132_v55  ;;  %v1134_v56 = vld [vmem:[%s2696_s0 + $0x228] sm:$0xff]  ;;  %v1138_v58 = vld [vmem:[%s2696_s0 + $0x298] sm:$0xff] }
  0x3e   :  { %v1136_v57 = vld [vmem:[%s2696_s0 + $0x5a8] sm:$0xff]  ;;  %1135 = vst [vmem:[%s2697_s1 + $0x1c8] sm:$0xff] %v1134_v56  ;;  %1139 = vst [vmem:[%s2697_s1 + $0x238] sm:$0xff] %v1138_v58  ;;  %v1140_v59 = vld [vmem:[%s2696_s0 + $0x618] sm:$0xff] }
  0x3f   :  { %1137 = vst [vmem:[%s2697_s1 + $0x548] sm:$0xff] %v1136_v57  ;;  %v1142_v60 = vld [vmem:[%s2696_s0 + $0x308] sm:$0xff]  ;;  %1141 = vst [vmem:[%s2697_s1 + $0x5b8] sm:$0xff] %v1140_v59  ;;  %v1146_v62 = vld [vmem:[%s2696_s0 + $0x378] sm:$0xff] }
  0x40   :  { %v1144_v61 = vld [vmem:[%s2696_s0 + $0x688] sm:$0xff]  ;;  %1143 = vst [vmem:[%s2697_s1 + $0x2a8] sm:$0xff] %v1142_v60  ;;  %v1148_v63 = vld [vmem:[%s2696_s0 + $0x6f8] sm:$0xff]  ;;  %1147 = vst [vmem:[%s2697_s1 + $0x318] sm:$0xff] %v1146_v62 }
  0x41   :  { %1145 = vst [vmem:[%s2697_s1 + $0x628] sm:$0xff] %v1144_v61  ;;  %v1150_v0 = vld [vmem:[%s2696_s0 + $0x58] sm:$0xff]  ;;  %1149 = vst [vmem:[%s2697_s1 + $0x698] sm:$0xff] %v1148_v63  ;;  %v1154_v2 = vld [vmem:[%s2696_s0 + $0xc8] sm:$0xff] }
  0x42   :  { %1151 = vst [vmem:[%s2697_s1 + $0x18] sm:$0xff] %v1150_v0  ;;  %v1152_v1 = vld [vmem:[%s2696_s0 + $0x3d8] sm:$0xff]  ;;  %v1156_v3 = vld [vmem:[%s2696_s0 + $0x448] sm:$0xff]  ;;  %1155 = vst [vmem:[%s2697_s1 + $0x88] sm:$0xff] %v1154_v2 }
  0x43   :  { %1153 = vst [vmem:[%s2697_s1 + $0x398] sm:$0xff] %v1152_v1  ;;  %1157 = vst [vmem:[%s2697_s1 + $0x408] sm:$0xff] %v1156_v3  ;;  %v1158_v4 = vld [vmem:[%s2696_s0 + $0x138] sm:$0xff]  ;;  %v1162_v6 = vld [vmem:[%s2696_s0 + $0x1a8] sm:$0xff] }
  0x44   :  { %v1160_v5 = vld [vmem:[%s2696_s0 + $0x4b8] sm:$0xff]  ;;  %1159 = vst [vmem:[%s2697_s1 + $0xf8] sm:$0xff] %v1158_v4  ;;  %1163 = vst [vmem:[%s2697_s1 + $0x168] sm:$0xff] %v1162_v6  ;;  %v1164_v7 = vld [vmem:[%s2696_s0 + $0x528] sm:$0xff] }
  0x45   :  { %1161 = vst [vmem:[%s2697_s1 + $0x478] sm:$0xff] %v1160_v5  ;;  %v1166_v8 = vld [vmem:[%s2696_s0 + $0x218] sm:$0xff]  ;;  %1165 = vst [vmem:[%s2697_s1 + $0x4e8] sm:$0xff] %v1164_v7  ;;  %v1170_v10 = vld [vmem:[%s2696_s0 + $0x288] sm:$0xff] }
  0x46   :  { %v1168_v9 = vld [vmem:[%s2696_s0 + $0x598] sm:$0xff]  ;;  %1167 = vst [vmem:[%s2697_s1 + $0x1d8] sm:$0xff] %v1166_v8  ;;  %v1172_v11 = vld [vmem:[%s2696_s0 + $0x608] sm:$0xff]  ;;  %1171 = vst [vmem:[%s2697_s1 + $0x248] sm:$0xff] %v1170_v10 }
  0x47   :  { %1169 = vst [vmem:[%s2697_s1 + $0x558] sm:$0xff] %v1168_v9  ;;  %v1174_v12 = vld [vmem:[%s2696_s0 + $0x2f8] sm:$0xff]  ;;  %1173 = vst [vmem:[%s2697_s1 + $0x5c8] sm:$0xff] %v1172_v11  ;;  %v1178_v14 = vld [vmem:[%s2696_s0 + $0x368] sm:$0xff] }
  0x48   :  { %1175 = vst [vmem:[%s2697_s1 + $0x2b8] sm:$0xff] %v1174_v12  ;;  %v1176_v13 = vld [vmem:[%s2696_s0 + $0x678] sm:$0xff]  ;;  %v1180_v15 = vld [vmem:[%s2696_s0 + $0x6e8] sm:$0xff]  ;;  %1179 = vst [vmem:[%s2697_s1 + $0x328] sm:$0xff] %v1178_v14 }
  0x49   :  { %1177 = vst [vmem:[%s2697_s1 + $0x638] sm:$0xff] %v1176_v13  ;;  %1181 = vst [vmem:[%s2697_s1 + $0x6a8] sm:$0xff] %v1180_v15  ;;  %v1182_v16 = vld [vmem:[%s2696_s0 + $0x48] sm:$0xff]  ;;  %v1186_v18 = vld [vmem:[%s2696_s0 + $0xb8] sm:$0xff] }
  0x4a   :  { %v1184_v17 = vld [vmem:[%s2696_s0 + $0x3c8] sm:$0xff]  ;;  %1183 = vst [vmem:[%s2697_s1 + $0x28] sm:$0xff] %v1182_v16  ;;  %1187 = vst [vmem:[%s2697_s1 + $0x98] sm:$0xff] %v1186_v18  ;;  %v1188_v19 = vld [vmem:[%s2696_s0 + $0x438] sm:$0xff] }
  0x4b   :  { %1185 = vst [vmem:[%s2697_s1 + $0x3a8] sm:$0xff] %v1184_v17  ;;  %v1190_v20 = vld [vmem:[%s2696_s0 + $0x128] sm:$0xff]  ;;  %1189 = vst [vmem:[%s2697_s1 + $0x418] sm:$0xff] %v1188_v19  ;;  %v1194_v22 = vld [vmem:[%s2696_s0 + $0x198] sm:$0xff] }
  0x4c   :  { %v1192_v21 = vld [vmem:[%s2696_s0 + $0x4a8] sm:$0xff]  ;;  %1191 = vst [vmem:[%s2697_s1 + $0x108] sm:$0xff] %v1190_v20  ;;  %v1196_v23 = vld [vmem:[%s2696_s0 + $0x518] sm:$0xff]  ;;  %1195 = vst [vmem:[%s2697_s1 + $0x178] sm:$0xff] %v1194_v22 }
  0x4d   :  { %1193 = vst [vmem:[%s2697_s1 + $0x488] sm:$0xff] %v1192_v21  ;;  %v1198_v24 = vld [vmem:[%s2696_s0 + $0x208] sm:$0xff]  ;;  %1197 = vst [vmem:[%s2697_s1 + $0x4f8] sm:$0xff] %v1196_v23  ;;  %v1202_v26 = vld [vmem:[%s2696_s0 + $0x278] sm:$0xff] }
  0x4e   :  { %1199 = vst [vmem:[%s2697_s1 + $0x1e8] sm:$0xff] %v1198_v24  ;;  %v1200_v25 = vld [vmem:[%s2696_s0 + $0x588] sm:$0xff]  ;;  %v1204_v27 = vld [vmem:[%s2696_s0 + $0x5f8] sm:$0xff]  ;;  %1203 = vst [vmem:[%s2697_s1 + $0x258] sm:$0xff] %v1202_v26 }
  0x4f   :  { %1201 = vst [vmem:[%s2697_s1 + $0x568] sm:$0xff] %v1200_v25  ;;  %1205 = vst [vmem:[%s2697_s1 + $0x5d8] sm:$0xff] %v1204_v27  ;;  %v1206_v28 = vld [vmem:[%s2696_s0 + $0x2e8] sm:$0xff]  ;;  %v1210_v30 = vld [vmem:[%s2696_s0 + $0x358] sm:$0xff] }
  0x50   :  { %v1208_v29 = vld [vmem:[%s2696_s0 + $0x668] sm:$0xff]  ;;  %1207 = vst [vmem:[%s2697_s1 + $0x2c8] sm:$0xff] %v1206_v28  ;;  %1211 = vst [vmem:[%s2697_s1 + $0x338] sm:$0xff] %v1210_v30  ;;  %v1212_v31 = vld [vmem:[%s2696_s0 + $0x6d8] sm:$0xff] }
  0x51   :  { %1209 = vst [vmem:[%s2697_s1 + $0x648] sm:$0xff] %v1208_v29  ;;  %v1214_v32 = vld [vmem:[%s2696_s0 + $0x38] sm:$0xff]  ;;  %1213 = vst [vmem:[%s2697_s1 + $0x6b8] sm:$0xff] %v1212_v31  ;;  %v1218_v34 = vld [vmem:[%s2696_s0 + $0xa8] sm:$0xff] }
  0x52   :  { %v1216_v33 = vld [vmem:[%s2696_s0 + $0x3b8] sm:$0xff]  ;;  %1215 = vst [vmem:[%s2697_s1 + $0x38] sm:$0xff] %v1214_v32  ;;  %v1220_v35 = vld [vmem:[%s2696_s0 + $0x428] sm:$0xff]  ;;  %1219 = vst [vmem:[%s2697_s1 + $0xa8] sm:$0xff] %v1218_v34 }
  0x53   :  { %1217 = vst [vmem:[%s2697_s1 + $0x3b8] sm:$0xff] %v1216_v33  ;;  %v1222_v36 = vld [vmem:[%s2696_s0 + $0x118] sm:$0xff]  ;;  %1221 = vst [vmem:[%s2697_s1 + $0x428] sm:$0xff] %v1220_v35  ;;  %v1226_v38 = vld [vmem:[%s2696_s0 + $0x188] sm:$0xff] }
  0x54   :  { %1223 = vst [vmem:[%s2697_s1 + $0x118] sm:$0xff] %v1222_v36  ;;  %v1224_v37 = vld [vmem:[%s2696_s0 + $0x498] sm:$0xff]  ;;  %v1228_v39 = vld [vmem:[%s2696_s0 + $0x508] sm:$0xff]  ;;  %1227 = vst [vmem:[%s2697_s1 + $0x188] sm:$0xff] %v1226_v38 }
  0x55   :  { %1225 = vst [vmem:[%s2697_s1 + $0x498] sm:$0xff] %v1224_v37  ;;  %1229 = vst [vmem:[%s2697_s1 + $0x508] sm:$0xff] %v1228_v39  ;;  %v1230_v40 = vld [vmem:[%s2696_s0 + $0x1f8] sm:$0xff]  ;;  %v1234_v42 = vld [vmem:[%s2696_s0 + $0x268] sm:$0xff] }
  0x56   :  { %v1232_v41 = vld [vmem:[%s2696_s0 + $0x578] sm:$0xff]  ;;  %1231 = vst [vmem:[%s2697_s1 + $0x1f8] sm:$0xff] %v1230_v40  ;;  %1235 = vst [vmem:[%s2697_s1 + $0x268] sm:$0xff] %v1234_v42  ;;  %v1236_v43 = vld [vmem:[%s2696_s0 + $0x5e8] sm:$0xff] }
  0x57   :  { %1233 = vst [vmem:[%s2697_s1 + $0x578] sm:$0xff] %v1232_v41  ;;  %v1238_v44 = vld [vmem:[%s2696_s0 + $0x2d8] sm:$0xff]  ;;  %1237 = vst [vmem:[%s2697_s1 + $0x5e8] sm:$0xff] %v1236_v43  ;;  %v1242_v46 = vld [vmem:[%s2696_s0 + $0x348] sm:$0xff] }
  0x58   :  { %v1240_v45 = vld [vmem:[%s2696_s0 + $0x658] sm:$0xff]  ;;  %1239 = vst [vmem:[%s2697_s1 + $0x2d8] sm:$0xff] %v1238_v44  ;;  %v1244_v47 = vld [vmem:[%s2696_s0 + $0x6c8] sm:$0xff]  ;;  %1243 = vst [vmem:[%s2697_s1 + $0x348] sm:$0xff] %v1242_v46 }
  0x59   :  { %1241 = vst [vmem:[%s2697_s1 + $0x658] sm:$0xff] %v1240_v45  ;;  %v1246_v48 = vld [vmem:[%s2696_s0 + $0x28] sm:$0xff]  ;;  %1245 = vst [vmem:[%s2697_s1 + $0x6c8] sm:$0xff] %v1244_v47  ;;  %v1250_v50 = vld [vmem:[%s2696_s0 + $0x98] sm:$0xff] }
  0x5a   :  { %1247 = vst [vmem:[%s2697_s1 + $0x48] sm:$0xff] %v1246_v48  ;;  %v1248_v49 = vld [vmem:[%s2696_s0 + $0x3a8] sm:$0xff]  ;;  %v1252_v51 = vld [vmem:[%s2696_s0 + $0x418] sm:$0xff]  ;;  %1251 = vst [vmem:[%s2697_s1 + $0xb8] sm:$0xff] %v1250_v50 }
  0x5b   :  { %1249 = vst [vmem:[%s2697_s1 + $0x3c8] sm:$0xff] %v1248_v49  ;;  %1253 = vst [vmem:[%s2697_s1 + $0x438] sm:$0xff] %v1252_v51  ;;  %v1254_v52 = vld [vmem:[%s2696_s0 + $0x108] sm:$0xff]  ;;  %v1258_v54 = vld [vmem:[%s2696_s0 + $0x178] sm:$0xff] }
  0x5c   :  { %v1256_v53 = vld [vmem:[%s2696_s0 + $0x488] sm:$0xff]  ;;  %1255 = vst [vmem:[%s2697_s1 + $0x128] sm:$0xff] %v1254_v52  ;;  %1259 = vst [vmem:[%s2697_s1 + $0x198] sm:$0xff] %v1258_v54  ;;  %v1260_v55 = vld [vmem:[%s2696_s0 + $0x4f8] sm:$0xff] }
  0x5d   :  { %1257 = vst [vmem:[%s2697_s1 + $0x4a8] sm:$0xff] %v1256_v53  ;;  %v1262_v56 = vld [vmem:[%s2696_s0 + $0x1e8] sm:$0xff]  ;;  %1261 = vst [vmem:[%s2697_s1 + $0x518] sm:$0xff] %v1260_v55  ;;  %v1266_v58 = vld [vmem:[%s2696_s0 + $0x258] sm:$0xff] }
  0x5e   :  { %v1264_v57 = vld [vmem:[%s2696_s0 + $0x568] sm:$0xff]  ;;  %1263 = vst [vmem:[%s2697_s1 + $0x208] sm:$0xff] %v1262_v56  ;;  %v1268_v59 = vld [vmem:[%s2696_s0 + $0x5d8] sm:$0xff]  ;;  %1267 = vst [vmem:[%s2697_s1 + $0x278] sm:$0xff] %v1266_v58 }
  0x5f   :  { %1265 = vst [vmem:[%s2697_s1 + $0x588] sm:$0xff] %v1264_v57  ;;  %v1270_v60 = vld [vmem:[%s2696_s0 + $0x2c8] sm:$0xff]  ;;  %1269 = vst [vmem:[%s2697_s1 + $0x5f8] sm:$0xff] %v1268_v59  ;;  %v1274_v62 = vld [vmem:[%s2696_s0 + $0x338] sm:$0xff] }
  0x60   :  { %1271 = vst [vmem:[%s2697_s1 + $0x2e8] sm:$0xff] %v1270_v60  ;;  %v1272_v61 = vld [vmem:[%s2696_s0 + $0x648] sm:$0xff]  ;;  %v1276_v63 = vld [vmem:[%s2696_s0 + $0x6b8] sm:$0xff]  ;;  %1275 = vst [vmem:[%s2697_s1 + $0x358] sm:$0xff] %v1274_v62 }
  0x61   :  { %1273 = vst [vmem:[%s2697_s1 + $0x668] sm:$0xff] %v1272_v61  ;;  %1277 = vst [vmem:[%s2697_s1 + $0x6d8] sm:$0xff] %v1276_v63  ;;  %v1278_v0 = vld [vmem:[%s2696_s0 + $0x18] sm:$0xff]  ;;  %v1282_v2 = vld [vmem:[%s2696_s0 + $0x88] sm:$0xff] }
  0x62   :  { %v1280_v1 = vld [vmem:[%s2696_s0 + $0x398] sm:$0xff]  ;;  %1279 = vst [vmem:[%s2697_s1 + $0x58] sm:$0xff] %v1278_v0  ;;  %1283 = vst [vmem:[%s2697_s1 + $0xc8] sm:$0xff] %v1282_v2  ;;  %v1284_v3 = vld [vmem:[%s2696_s0 + $0x408] sm:$0xff] }
  0x63   :  { %1281 = vst [vmem:[%s2697_s1 + $0x3d8] sm:$0xff] %v1280_v1  ;;  %v1286_v4 = vld [vmem:[%s2696_s0 + $0xf8] sm:$0xff]  ;;  %1285 = vst [vmem:[%s2697_s1 + $0x448] sm:$0xff] %v1284_v3  ;;  %v1290_v6 = vld [vmem:[%s2696_s0 + $0x168] sm:$0xff] }
  0x64   :  { %v1288_v5 = vld [vmem:[%s2696_s0 + $0x478] sm:$0xff]  ;;  %1287 = vst [vmem:[%s2697_s1 + $0x138] sm:$0xff] %v1286_v4  ;;  %v1292_v7 = vld [vmem:[%s2696_s0 + $0x4e8] sm:$0xff]  ;;  %1291 = vst [vmem:[%s2697_s1 + $0x1a8] sm:$0xff] %v1290_v6 }
  0x65   :  { %1289 = vst [vmem:[%s2697_s1 + $0x4b8] sm:$0xff] %v1288_v5  ;;  %v1294_v8 = vld [vmem:[%s2696_s0 + $0x1d8] sm:$0xff]  ;;  %1293 = vst [vmem:[%s2697_s1 + $0x528] sm:$0xff] %v1292_v7  ;;  %v1298_v10 = vld [vmem:[%s2696_s0 + $0x248] sm:$0xff] }
  0x66   :  { %1295 = vst [vmem:[%s2697_s1 + $0x218] sm:$0xff] %v1294_v8  ;;  %v1296_v9 = vld [vmem:[%s2696_s0 + $0x558] sm:$0xff]  ;;  %v1300_v11 = vld [vmem:[%s2696_s0 + $0x5c8] sm:$0xff]  ;;  %1299 = vst [vmem:[%s2697_s1 + $0x288] sm:$0xff] %v1298_v10 }
  0x67   :  { %1297 = vst [vmem:[%s2697_s1 + $0x598] sm:$0xff] %v1296_v9  ;;  %1301 = vst [vmem:[%s2697_s1 + $0x608] sm:$0xff] %v1300_v11  ;;  %v1302_v12 = vld [vmem:[%s2696_s0 + $0x2b8] sm:$0xff]  ;;  %v1306_v14 = vld [vmem:[%s2696_s0 + $0x328] sm:$0xff] }
  0x68   :  { %v1304_v13 = vld [vmem:[%s2696_s0 + $0x638] sm:$0xff]  ;;  %1303 = vst [vmem:[%s2697_s1 + $0x2f8] sm:$0xff] %v1302_v12  ;;  %1307 = vst [vmem:[%s2697_s1 + $0x368] sm:$0xff] %v1306_v14  ;;  %v1308_v15 = vld [vmem:[%s2696_s0 + $0x6a8] sm:$0xff] }
  0x69   :  { %1305 = vst [vmem:[%s2697_s1 + $0x678] sm:$0xff] %v1304_v13  ;;  %v1310_v16 = vld [vmem:[%s2696_s0 + $0x8] sm:$0xff]  ;;  %1309 = vst [vmem:[%s2697_s1 + $0x6e8] sm:$0xff] %v1308_v15  ;;  %v1314_v18 = vld [vmem:[%s2696_s0 + $0x78] sm:$0xff] }
  0x6a   :  { %v1312_v17 = vld [vmem:[%s2696_s0 + $0x388] sm:$0xff]  ;;  %1311 = vst [vmem:[%s2697_s1 + $0x68] sm:$0xff] %v1310_v16  ;;  %v1316_v19 = vld [vmem:[%s2696_s0 + $0x3f8] sm:$0xff]  ;;  %1315 = vst [vmem:[%s2697_s1 + $0xd8] sm:$0xff] %v1314_v18 }
  0x6b   :  { %1313 = vst [vmem:[%s2697_s1 + $0x3e8] sm:$0xff] %v1312_v17  ;;  %v1318_v20 = vld [vmem:[%s2696_s0 + $0xe8] sm:$0xff]  ;;  %1317 = vst [vmem:[%s2697_s1 + $0x458] sm:$0xff] %v1316_v19  ;;  %v1322_v22 = vld [vmem:[%s2696_s0 + $0x158] sm:$0xff] }
  0x6c   :  { %1319 = vst [vmem:[%s2697_s1 + $0x148] sm:$0xff] %v1318_v20  ;;  %v1320_v21 = vld [vmem:[%s2696_s0 + $0x468] sm:$0xff]  ;;  %v1324_v23 = vld [vmem:[%s2696_s0 + $0x4d8] sm:$0xff]  ;;  %1323 = vst [vmem:[%s2697_s1 + $0x1b8] sm:$0xff] %v1322_v22 }
  0x6d   :  { %1321 = vst [vmem:[%s2697_s1 + $0x4c8] sm:$0xff] %v1320_v21  ;;  %1325 = vst [vmem:[%s2697_s1 + $0x538] sm:$0xff] %v1324_v23  ;;  %v1326_v24 = vld [vmem:[%s2696_s0 + $0x1c8] sm:$0xff]  ;;  %v1330_v26 = vld [vmem:[%s2696_s0 + $0x238] sm:$0xff] }
  0x6e   :  { %v1328_v25 = vld [vmem:[%s2696_s0 + $0x548] sm:$0xff]  ;;  %1327 = vst [vmem:[%s2697_s1 + $0x228] sm:$0xff] %v1326_v24  ;;  %1331 = vst [vmem:[%s2697_s1 + $0x298] sm:$0xff] %v1330_v26  ;;  %v1332_v27 = vld [vmem:[%s2696_s0 + $0x5b8] sm:$0xff] }
  0x6f   :  { %1329 = vst [vmem:[%s2697_s1 + $0x5a8] sm:$0xff] %v1328_v25  ;;  %v1334_v28 = vld [vmem:[%s2696_s0 + $0x2a8] sm:$0xff]  ;;  %1333 = vst [vmem:[%s2697_s1 + $0x618] sm:$0xff] %v1332_v27  ;;  %v1338_v30 = vld [vmem:[%s2696_s0 + $0x318] sm:$0xff] }
  0x70   :  { %v1336_v29 = vld [vmem:[%s2696_s0 + $0x628] sm:$0xff]  ;;  %1335 = vst [vmem:[%s2697_s1 + $0x308] sm:$0xff] %v1334_v28  ;;  %v1340_v31 = vld [vmem:[%s2696_s0 + $0x698] sm:$0xff]  ;;  %1339 = vst [vmem:[%s2697_s1 + $0x378] sm:$0xff] %v1338_v30 }
  0x71   :  { %1337 = vst [vmem:[%s2697_s1 + $0x688] sm:$0xff] %v1336_v29  ;;  %1341 = vst [vmem:[%s2697_s1 + $0x6f8] sm:$0xff] %v1340_v31 }

</bundles_post_ra>
